<compile_context>
chip_gen: v6e
topology: v6e:2x2x1
jax: 0.10.0
libtpu: 0.0.40
codegen_flags: <defaults>
</compile_context>

<pallas_src>
import functools

import jax
import jax.numpy as jnp
from jax.experimental import pallas as pl
from jax.experimental.pallas import tpu as pltpu

OBS_DIM = 11
HIDDEN_DIM = 128
FC_DIM = 128


def _disc_kernel(x_ref, wih_ref, whh_ref, b_ref, w1_ref, b1_ref, w2_ref, b2_ref,
                 out_ref, gx_ref):
    # Shapes (all static):
    #   x_ref   : (T*Bp, D)   f32   time-major flattened input
    #   wih_ref : (D, 4H)     bf16  W_ih^T, gate columns permuted to [i,f,o,g]
    #   whh_ref : (H, 4H)     bf16  W_hh^T, same permutation
    #   b_ref   : (1, 4H)     f32   b_ih + b_hh, same permutation
    #   w1_ref  : (H, FC)     bf16  fc1 W^T,  b1_ref: (1, FC) f32
    #   w2_ref  : (1, FC)     f32   fc2 W (native row; consumed on the VPU)
    #   b2_ref  : (1, 1)      f32
    #   out_ref : (Bp, 1)     f32
    #   gx_ref  : (T*Bp, 4H)  f32   scratch: hoisted input projection
    Bp = out_ref.shape[0]
    H = whh_ref.shape[0]
    T = x_ref.shape[0] // Bp

    # Hoisted input projection: one MXU matmul covering all T time steps,
    # bf16 operands, f32 accumulation, bias added in f32.
    gx_ref[...] = (jnp.dot(x_ref[...].astype(jnp.bfloat16), wih_ref[...],
                           preferred_element_type=jnp.float32)
                   + b_ref[...])

    def step(t, carry):
        h, c = carry                                   # f32 state
        start = pl.multiple_of(t * Bp, Bp)             # sublane-aligned slice
        # W_hh read from VMEM inside the loop (no 32-vreg value kept live
        # across the unrolled body); bf16 LHS push per step, f32 accumulate.
        gates = gx_ref[pl.ds(start, Bp), :] + jnp.dot(
            h.astype(jnp.bfloat16), whh_ref[...],
            preferred_element_type=jnp.float32)        # (Bp, 4H) f32

        # Gate columns are pre-permuted to [i, f, o, g]: one sigmoid over a
        # contiguous, lane-aligned (Bp, 3H) slice and one tanh over (Bp, H).
        ifo = jax.nn.sigmoid(gates[:, 0:3 * H])
        i_g = ifo[:, 0:H]
        f_g = ifo[:, H:2 * H]
        o_g = ifo[:, 2 * H:3 * H]
        g_g = jnp.tanh(gates[:, 3 * H:4 * H])

        c_new = f_g * c + i_g * g_g
        h_new = o_g * jnp.tanh(c_new)
        return (h_new, c_new)

    h0 = jnp.zeros((Bp, H), jnp.float32)
    c0 = jnp.zeros((Bp, H), jnp.float32)
    # Bounded unroll: full for small T, factor 8 otherwise (keeps vreg pressure
    # flat while preserving LLO scheduling visibility).
    h_last, _ = jax.lax.fori_loop(0, T, step, (h0, c0), unroll=min(T, 8))

    # fc head: Linear(H, 128) -> LeakyReLU(0.2) -> Linear(128, 1)
    z1 = (jnp.dot(h_last.astype(jnp.bfloat16), w1_ref[...],
                  preferred_element_type=jnp.float32) + b1_ref[...])
    a1 = jnp.where(z1 > 0, z1, 0.2 * z1)
    # fc2: N=1 output column -> VPU multiply + XLU lane reduce (no MXU matmul,
    # no lane-sparse output path).
    z2 = jnp.sum(a1 * w2_ref[...], axis=-1, keepdims=True) + b2_ref[...]
    out_ref[...] = z2.astype(out_ref.dtype)


def prepare_params(params):
    """One-time parameter layout prep. Call ONCE, reuse the result every forward.

    Does: transposes, gate-column permutation [i,f,g,o] -> [i,f,o,g], bias fuse,
    bf16 casts for MXU operands. Keeps biases and the fc2 row in f32.
    """
    H = HIDDEN_DIM

    def permute_gates(a):  # last axis laid out [i|f|g|o] -> [i|f|o|g]
        i, f, g, o = jnp.split(a, 4, axis=-1)
        return jnp.concatenate([i, f, o, g], axis=-1)

    wih_t = permute_gates(params["w_ih"].T).astype(jnp.bfloat16)        # (D, 4H)
    whh_t = permute_gates(params["w_hh"].T).astype(jnp.bfloat16)        # (H, 4H)
    b = permute_gates(
        (params["b_ih"] + params["b_hh"]).reshape(1, 4 * H)).astype(jnp.float32)
    w1_t = params["fc1_w"].T.astype(jnp.bfloat16)                       # (H, FC)
    b1 = params["fc1_b"].reshape(1, FC_DIM).astype(jnp.float32)
    w2 = params["fc2_w"].reshape(1, FC_DIM).astype(jnp.float32)         # (1, FC)
    b2 = params["fc2_b"].reshape(1, 1).astype(jnp.float32)
    return (wih_t, whh_t, b, w1_t, b1, w2, b2)


@jax.jit
def discriminator_forward(x, prepped):
    """x: (B, T, D) float32, batch_first (PyTorch convention).
    prepped: output of prepare_params (kernel-ready arrays, prepared once)."""
    wih_t, whh_t, b, w1_t, b1, w2, b2 = prepped
    B, T, D = x.shape
    Bp = ((B + 7) // 8) * 8  # pad batch to the f32 sublane count

    xt = jnp.transpose(x, (1, 0, 2)).astype(jnp.float32)        # (T, B, D)
    xt = jnp.pad(xt, ((0, 0), (0, Bp - B), (0, 0)))             # (T, Bp, D)
    xflat = xt.reshape(T * Bp, D)                               # time-major flat

    out = pl.pallas_call(
        _disc_kernel,
        out_shape=jax.ShapeDtypeStruct((Bp, 1), jnp.float32),
        # No grid: everything (< 1 MiB at these sizes) is VMEM-resident for the
        # whole kernel.
        scratch_shapes=[pltpu.VMEM((T * Bp, 4 * HIDDEN_DIM), jnp.float32)],
    )(xflat, wih_t, whh_t, b, w1_t, b1, w2, b2)
    return out[:B]


def init_params(key, obs_dim=OBS_DIM, hidden_dim=HIDDEN_DIM):
    """Deterministic init, shapes matching nn.LSTM / nn.Linear."""
    ks = jax.random.split(key, 8)
    s_lstm = 1.0 / jnp.sqrt(hidden_dim)
    s_fc1 = 1.0 / jnp.sqrt(hidden_dim)
    s_fc2 = 1.0 / jnp.sqrt(FC_DIM)
    u = lambda k, shape, s: jax.random.uniform(k, shape, jnp.float32, -s, s)
    return {
        "w_ih": u(ks[0], (4 * hidden_dim, obs_dim), s_lstm),
        "w_hh": u(ks[1], (4 * hidden_dim, hidden_dim), s_lstm),
        "b_ih": u(ks[2], (4 * hidden_dim,), s_lstm),
        "b_hh": u(ks[3], (4 * hidden_dim,), s_lstm),
        "fc1_w": u(ks[4], (FC_DIM, hidden_dim), s_fc1),
        "fc1_b": u(ks[5], (FC_DIM,), s_fc1),
        "fc2_w": u(ks[6], (1, FC_DIM), s_fc2),
        "fc2_b": u(ks[7], (1,), s_fc2),
    }


def discriminator_reference(x, params):
    """Pure-JAX f32 reference (lax.scan LSTM) for validation."""
    H = HIDDEN_DIM
    wih_t = params["w_ih"].T
    whh_t = params["w_hh"].T
    b = params["b_ih"] + params["b_hh"]

    def step(carry, x_t):
        h, c = carry
        gates = x_t @ wih_t + h @ whh_t + b
        i = jax.nn.sigmoid(gates[:, 0 * H:1 * H])
        f = jax.nn.sigmoid(gates[:, 1 * H:2 * H])
        g = jnp.tanh(gates[:, 2 * H:3 * H])
        o = jax.nn.sigmoid(gates[:, 3 * H:4 * H])
        c = f * c + i * g
        h = o * jnp.tanh(c)
        return (h, c), None

    B = x.shape[0]
    h0 = jnp.zeros((B, H), jnp.float32)
    c0 = jnp.zeros((B, H), jnp.float32)
    (h_last, _), _ = jax.lax.scan(step, (h0, c0), jnp.transpose(x, (1, 0, 2)))
    z1 = h_last @ params["fc1_w"].T + params["fc1_b"]
    a1 = jnp.where(z1 > 0, z1, 0.2 * z1)
    return a1 @ params["fc2_w"].T + params["fc2_b"]


if __name__ == "__main__":
    key = jax.random.PRNGKey(0)
    k_x, k_p = jax.random.split(key)

    B, T, D = 2, 8, OBS_DIM
    x = jax.random.normal(k_x, (B, T, D), dtype=jnp.float32)
    params = init_params(k_p)
    prepped = prepare_params(params)  # one-time layout prep (not per call)

    out = discriminator_forward(x, prepped)
    out = jax.block_until_ready(out)

    ref = discriminator_reference(x, params)
    assert out.shape == (B, 1)
    # bf16 MXU operands over the T-step recurrence -> looser tolerance vs the
    # pure-f32 reference (state / accumulation stay f32).
    assert jnp.allclose(out, ref, atol=2e-2, rtol=2e-2), (out, ref)

    print("KERNEL_OK")
</pallas_src>

<mosaic_0001>
module attributes {stable_mosaic.version = 11 : i64} {
  func.func @_disc_kernel(%arg0: memref<64x11xf32, #tpu.memory_space<vmem>>, %arg1: memref<11x512xbf16, #tpu.memory_space<vmem>>, %arg2: memref<128x512xbf16, #tpu.memory_space<vmem>>, %arg3: memref<1x512xf32, #tpu.memory_space<vmem>>, %arg4: memref<128x128xbf16, #tpu.memory_space<vmem>>, %arg5: memref<1x128xf32, #tpu.memory_space<vmem>>, %arg6: memref<1x128xf32, #tpu.memory_space<vmem>>, %arg7: memref<1x1xf32, #tpu.memory_space<vmem>>, %arg8: memref<8x1xf32, #tpu.memory_space<vmem>>, %arg9: memref<64x512xf32, #tpu.memory_space<vmem>>) attributes {dimension_semantics = [], scalar_prefetch = 0 : i64, scratch_operands = 1 : i64, tpu.core_type = #tpu.core_type<tc>} {
    %c0 = arith.constant 0 : index
    %c0_0 = arith.constant 0 : index
    %0 = vector.load %arg0[%c0, %c0_0] : memref<64x11xf32, #tpu.memory_space<vmem>>, vector<64x11xf32>
    %1 = arith.truncf %0 : vector<64x11xf32> to vector<64x11xbf16>
    %c0_1 = arith.constant 0 : index
    %c0_2 = arith.constant 0 : index
    %2 = vector.load %arg1[%c0_1, %c0_2] : memref<11x512xbf16, #tpu.memory_space<vmem>>, vector<11x512xbf16>
    %cst = arith.constant dense<0.000000e+00> : vector<64x512xf32>
    %3 = tpu.matmul %1, %2, %cst {dimension_numbers = #tpu.dot_dimension_numbers<[1], [0], [0], [1], [0, 0, 1, 1], [], []>} : vector<64x11xbf16>, vector<11x512xbf16>, vector<64x512xf32> -> vector<64x512xf32>
    %c0_3 = arith.constant 0 : index
    %c0_4 = arith.constant 0 : index
    %4 = vector.load %arg3[%c0_3, %c0_4] : memref<1x512xf32, #tpu.memory_space<vmem>>, vector<1x512xf32>
    %5 = vector.broadcast %4 : vector<1x512xf32> to vector<64x512xf32>
    %6 = arith.addf %3, %5 : vector<64x512xf32>
    %c0_5 = arith.constant 0 : index
    %c0_6 = arith.constant 0 : index
    %7 = vector.load %arg9[%c0_5, %c0_6] : memref<64x512xf32, #tpu.memory_space<vmem>>, vector<64x512xf32>
    tpu.vector_store %arg9[%c0_5, %c0_6], %6 {strides = array<i32>} : memref<64x512xf32, #tpu.memory_space<vmem>>, vector<64x512xf32>,
    %cst_7 = arith.constant 0.000000e+00 : f32
    %8 = vector.broadcast %cst_7 : f32 to vector<8x128xf32>
    %cst_8 = arith.constant 0.000000e+00 : f32
    %9 = vector.broadcast %cst_8 : f32 to vector<8x128xf32>
    %c0_i32 = arith.constant 0 : i32
    %c8_i32 = arith.constant 8 : i32
    %10 = arith.muli %c0_i32, %c8_i32 : i32
    %11 = tpu.assume_multiple %10, 8 : i32
    %12 = arith.index_cast %11 : i32 to index
    %c0_9 = arith.constant 0 : index
    %13 = vector.load %arg9[%12, %c0_9] : memref<64x512xf32, #tpu.memory_space<vmem>>, vector<8x512xf32>
    %14 = arith.truncf %8 : vector<8x128xf32> to vector<8x128xbf16>
    %c0_10 = arith.constant 0 : index
    %c0_11 = arith.constant 0 : index
    %15 = vector.load %arg2[%c0_10, %c0_11] : memref<128x512xbf16, #tpu.memory_space<vmem>>, vector<128x512xbf16>
    %cst_12 = arith.constant dense<0.000000e+00> : vector<8x512xf32>
    %16 = tpu.matmul %14, %15, %cst_12 {dimension_numbers = #tpu.dot_dimension_numbers<[1], [0], [0], [1], [0, 0, 1, 1], [], []>} : vector<8x128xbf16>, vector<128x512xbf16>, vector<8x512xf32> -> vector<8x512xf32>
    %17 = arith.addf %13, %16 : vector<8x512xf32>
    %18 = vector.extract_strided_slice %17 {offsets = [0, 0], sizes = [8, 384], strides = [1, 1]} : vector<8x512xf32> to vector<8x384xf32>
    %19 = arith.negf %18 : vector<8x384xf32>
    %20 = math.exp %19 : vector<8x384xf32>
    %cst_13 = arith.constant 1.000000e+00 : f32
    %21 = vector.broadcast %cst_13 : f32 to vector<8x384xf32>
    %22 = arith.addf %21, %20 : vector<8x384xf32>
    %23 = arith.divf %21, %22 : vector<8x384xf32>
    %24 = vector.extract_strided_slice %23 {offsets = [0, 0], sizes = [8, 128], strides = [1, 1]} : vector<8x384xf32> to vector<8x128xf32>
    %25 = vector.extract_strided_slice %23 {offsets = [0, 128], sizes = [8, 128], strides = [1, 1]} : vector<8x384xf32> to vector<8x128xf32>
    %26 = vector.extract_strided_slice %23 {offsets = [0, 256], sizes = [8, 128], strides = [1, 1]} : vector<8x384xf32> to vector<8x128xf32>
    %27 = vector.extract_strided_slice %17 {offsets = [0, 384], sizes = [8, 128], strides = [1, 1]} : vector<8x512xf32> to vector<8x128xf32>
    %28 = math.tanh %27 : vector<8x128xf32>
    %29 = arith.mulf %25, %9 : vector<8x128xf32>
    %30 = arith.mulf %24, %28 : vector<8x128xf32>
    %31 = arith.addf %29, %30 : vector<8x128xf32>
    %32 = math.tanh %31 : vector<8x128xf32>
    %33 = arith.mulf %26, %32 : vector<8x128xf32>
    %c1_i32 = arith.constant 1 : i32
    %c8_i32_14 = arith.constant 8 : i32
    %34 = arith.muli %c1_i32, %c8_i32_14 : i32
    %35 = tpu.assume_multiple %34, 8 : i32
    %36 = arith.index_cast %35 : i32 to index
    %c0_15 = arith.constant 0 : index
    %37 = vector.load %arg9[%36, %c0_15] : memref<64x512xf32, #tpu.memory_space<vmem>>, vector<8x512xf32>
    %38 = arith.truncf %33 : vector<8x128xf32> to vector<8x128xbf16>
    %c0_16 = arith.constant 0 : index
    %c0_17 = arith.constant 0 : index
    %39 = vector.load %arg2[%c0_16, %c0_17] : memref<128x512xbf16, #tpu.memory_space<vmem>>, vector<128x512xbf16>
    %cst_18 = arith.constant dense<0.000000e+00> : vector<8x512xf32>
    %40 = tpu.matmul %38, %39, %cst_18 {dimension_numbers = #tpu.dot_dimension_numbers<[1], [0], [0], [1], [0, 0, 1, 1], [], []>} : vector<8x128xbf16>, vector<128x512xbf16>, vector<8x512xf32> -> vector<8x512xf32>
    %41 = arith.addf %37, %40 : vector<8x512xf32>
    %42 = vector.extract_strided_slice %41 {offsets = [0, 0], sizes = [8, 384], strides = [1, 1]} : vector<8x512xf32> to vector<8x384xf32>
    %43 = arith.negf %42 : vector<8x384xf32>
    %44 = math.exp %43 : vector<8x384xf32>
    %cst_19 = arith.constant 1.000000e+00 : f32
    %45 = vector.broadcast %cst_19 : f32 to vector<8x384xf32>
    %46 = arith.addf %45, %44 : vector<8x384xf32>
    %47 = arith.divf %45, %46 : vector<8x384xf32>
    %48 = vector.extract_strided_slice %47 {offsets = [0, 0], sizes = [8, 128], strides = [1, 1]} : vector<8x384xf32> to vector<8x128xf32>
    %49 = vector.extract_strided_slice %47 {offsets = [0, 128], sizes = [8, 128], strides = [1, 1]} : vector<8x384xf32> to vector<8x128xf32>
    %50 = vector.extract_strided_slice %47 {offsets = [0, 256], sizes = [8, 128], strides = [1, 1]} : vector<8x384xf32> to vector<8x128xf32>
    %51 = vector.extract_strided_slice %41 {offsets = [0, 384], sizes = [8, 128], strides = [1, 1]} : vector<8x512xf32> to vector<8x128xf32>
    %52 = math.tanh %51 : vector<8x128xf32>
    %53 = arith.mulf %49, %31 : vector<8x128xf32>
    %54 = arith.mulf %48, %52 : vector<8x128xf32>
    %55 = arith.addf %53, %54 : vector<8x128xf32>
    %56 = math.tanh %55 : vector<8x128xf32>
    %57 = arith.mulf %50, %56 : vector<8x128xf32>
    %c2_i32 = arith.constant 2 : i32
    %c8_i32_20 = arith.constant 8 : i32
    %58 = arith.muli %c2_i32, %c8_i32_20 : i32
    %59 = tpu.assume_multiple %58, 8 : i32
    %60 = arith.index_cast %59 : i32 to index
    %c0_21 = arith.constant 0 : index
    %61 = vector.load %arg9[%60, %c0_21] : memref<64x512xf32, #tpu.memory_space<vmem>>, vector<8x512xf32>
    %62 = arith.truncf %57 : vector<8x128xf32> to vector<8x128xbf16>
    %c0_22 = arith.constant 0 : index
    %c0_23 = arith.constant 0 : index
    %63 = vector.load %arg2[%c0_22, %c0_23] : memref<128x512xbf16, #tpu.memory_space<vmem>>, vector<128x512xbf16>
    %cst_24 = arith.constant dense<0.000000e+00> : vector<8x512xf32>
    %64 = tpu.matmul %62, %63, %cst_24 {dimension_numbers = #tpu.dot_dimension_numbers<[1], [0], [0], [1], [0, 0, 1, 1], [], []>} : vector<8x128xbf16>, vector<128x512xbf16>, vector<8x512xf32> -> vector<8x512xf32>
    %65 = arith.addf %61, %64 : vector<8x512xf32>
    %66 = vector.extract_strided_slice %65 {offsets = [0, 0], sizes = [8, 384], strides = [1, 1]} : vector<8x512xf32> to vector<8x384xf32>
    %67 = arith.negf %66 : vector<8x384xf32>
    %68 = math.exp %67 : vector<8x384xf32>
    %cst_25 = arith.constant 1.000000e+00 : f32
    %69 = vector.broadcast %cst_25 : f32 to vector<8x384xf32>
    %70 = arith.addf %69, %68 : vector<8x384xf32>
    %71 = arith.divf %69, %70 : vector<8x384xf32>
    %72 = vector.extract_strided_slice %71 {offsets = [0, 0], sizes = [8, 128], strides = [1, 1]} : vector<8x384xf32> to vector<8x128xf32>
    %73 = vector.extract_strided_slice %71 {offsets = [0, 128], sizes = [8, 128], strides = [1, 1]} : vector<8x384xf32> to vector<8x128xf32>
    %74 = vector.extract_strided_slice %71 {offsets = [0, 256], sizes = [8, 128], strides = [1, 1]} : vector<8x384xf32> to vector<8x128xf32>
    %75 = vector.extract_strided_slice %65 {offsets = [0, 384], sizes = [8, 128], strides = [1, 1]} : vector<8x512xf32> to vector<8x128xf32>
    %76 = math.tanh %75 : vector<8x128xf32>
    %77 = arith.mulf %73, %55 : vector<8x128xf32>
    %78 = arith.mulf %72, %76 : vector<8x128xf32>
    %79 = arith.addf %77, %78 : vector<8x128xf32>
    %80 = math.tanh %79 : vector<8x128xf32>
    %81 = arith.mulf %74, %80 : vector<8x128xf32>
    %c3_i32 = arith.constant 3 : i32
    %c8_i32_26 = arith.constant 8 : i32
    %82 = arith.muli %c3_i32, %c8_i32_26 : i32
    %83 = tpu.assume_multiple %82, 8 : i32
    %84 = arith.index_cast %83 : i32 to index
    %c0_27 = arith.constant 0 : index
    %85 = vector.load %arg9[%84, %c0_27] : memref<64x512xf32, #tpu.memory_space<vmem>>, vector<8x512xf32>
    %86 = arith.truncf %81 : vector<8x128xf32> to vector<8x128xbf16>
    %c0_28 = arith.constant 0 : index
    %c0_29 = arith.constant 0 : index
    %87 = vector.load %arg2[%c0_28, %c0_29] : memref<128x512xbf16, #tpu.memory_space<vmem>>, vector<128x512xbf16>
    %cst_30 = arith.constant dense<0.000000e+00> : vector<8x512xf32>
    %88 = tpu.matmul %86, %87, %cst_30 {dimension_numbers = #tpu.dot_dimension_numbers<[1], [0], [0], [1], [0, 0, 1, 1], [], []>} : vector<8x128xbf16>, vector<128x512xbf16>, vector<8x512xf32> -> vector<8x512xf32>
    %89 = arith.addf %85, %88 : vector<8x512xf32>
    %90 = vector.extract_strided_slice %89 {offsets = [0, 0], sizes = [8, 384], strides = [1, 1]} : vector<8x512xf32> to vector<8x384xf32>
    %91 = arith.negf %90 : vector<8x384xf32>
    %92 = math.exp %91 : vector<8x384xf32>
    %cst_31 = arith.constant 1.000000e+00 : f32
    %93 = vector.broadcast %cst_31 : f32 to vector<8x384xf32>
    %94 = arith.addf %93, %92 : vector<8x384xf32>
    %95 = arith.divf %93, %94 : vector<8x384xf32>
    %96 = vector.extract_strided_slice %95 {offsets = [0, 0], sizes = [8, 128], strides = [1, 1]} : vector<8x384xf32> to vector<8x128xf32>
    %97 = vector.extract_strided_slice %95 {offsets = [0, 128], sizes = [8, 128], strides = [1, 1]} : vector<8x384xf32> to vector<8x128xf32>
    %98 = vector.extract_strided_slice %95 {offsets = [0, 256], sizes = [8, 128], strides = [1, 1]} : vector<8x384xf32> to vector<8x128xf32>
    %99 = vector.extract_strided_slice %89 {offsets = [0, 384], sizes = [8, 128], strides = [1, 1]} : vector<8x512xf32> to vector<8x128xf32>
    %100 = math.tanh %99 : vector<8x128xf32>
    %101 = arith.mulf %97, %79 : vector<8x128xf32>
    %102 = arith.mulf %96, %100 : vector<8x128xf32>
    %103 = arith.addf %101, %102 : vector<8x128xf32>
    %104 = math.tanh %103 : vector<8x128xf32>
    %105 = arith.mulf %98, %104 : vector<8x128xf32>
    %c4_i32 = arith.constant 4 : i32
    %c8_i32_32 = arith.constant 8 : i32
    %106 = arith.muli %c4_i32, %c8_i32_32 : i32
    %107 = tpu.assume_multiple %106, 8 : i32
    %108 = arith.index_cast %107 : i32 to index
    %c0_33 = arith.constant 0 : index
    %109 = vector.load %arg9[%108, %c0_33] : memref<64x512xf32, #tpu.memory_space<vmem>>, vector<8x512xf32>
    %110 = arith.truncf %105 : vector<8x128xf32> to vector<8x128xbf16>
    %c0_34 = arith.constant 0 : index
    %c0_35 = arith.constant 0 : index
    %111 = vector.load %arg2[%c0_34, %c0_35] : memref<128x512xbf16, #tpu.memory_space<vmem>>, vector<128x512xbf16>
    %cst_36 = arith.constant dense<0.000000e+00> : vector<8x512xf32>
    %112 = tpu.matmul %110, %111, %cst_36 {dimension_numbers = #tpu.dot_dimension_numbers<[1], [0], [0], [1], [0, 0, 1, 1], [], []>} : vector<8x128xbf16>, vector<128x512xbf16>, vector<8x512xf32> -> vector<8x512xf32>
    %113 = arith.addf %109, %112 : vector<8x512xf32>
    %114 = vector.extract_strided_slice %113 {offsets = [0, 0], sizes = [8, 384], strides = [1, 1]} : vector<8x512xf32> to vector<8x384xf32>
    %115 = arith.negf %114 : vector<8x384xf32>
    %116 = math.exp %115 : vector<8x384xf32>
    %cst_37 = arith.constant 1.000000e+00 : f32
    %117 = vector.broadcast %cst_37 : f32 to vector<8x384xf32>
    %118 = arith.addf %117, %116 : vector<8x384xf32>
    %119 = arith.divf %117, %118 : vector<8x384xf32>
    %120 = vector.extract_strided_slice %119 {offsets = [0, 0], sizes = [8, 128], strides = [1, 1]} : vector<8x384xf32> to vector<8x128xf32>
    %121 = vector.extract_strided_slice %119 {offsets = [0, 128], sizes = [8, 128], strides = [1, 1]} : vector<8x384xf32> to vector<8x128xf32>
    %122 = vector.extract_strided_slice %119 {offsets = [0, 256], sizes = [8, 128], strides = [1, 1]} : vector<8x384xf32> to vector<8x128xf32>
    %123 = vector.extract_strided_slice %113 {offsets = [0, 384], sizes = [8, 128], strides = [1, 1]} : vector<8x512xf32> to vector<8x128xf32>
    %124 = math.tanh %123 : vector<8x128xf32>
    %125 = arith.mulf %121, %103 : vector<8x128xf32>
    %126 = arith.mulf %120, %124 : vector<8x128xf32>
    %127 = arith.addf %125, %126 : vector<8x128xf32>
    %128 = math.tanh %127 : vector<8x128xf32>
    %129 = arith.mulf %122, %128 : vector<8x128xf32>
    %c5_i32 = arith.constant 5 : i32
    %c8_i32_38 = arith.constant 8 : i32
    %130 = arith.muli %c5_i32, %c8_i32_38 : i32
    %131 = tpu.assume_multiple %130, 8 : i32
    %132 = arith.index_cast %131 : i32 to index
    %c0_39 = arith.constant 0 : index
    %133 = vector.load %arg9[%132, %c0_39] : memref<64x512xf32, #tpu.memory_space<vmem>>, vector<8x512xf32>
    %134 = arith.truncf %129 : vector<8x128xf32> to vector<8x128xbf16>
    %c0_40 = arith.constant 0 : index
    %c0_41 = arith.constant 0 : index
    %135 = vector.load %arg2[%c0_40, %c0_41] : memref<128x512xbf16, #tpu.memory_space<vmem>>, vector<128x512xbf16>
    %cst_42 = arith.constant dense<0.000000e+00> : vector<8x512xf32>
    %136 = tpu.matmul %134, %135, %cst_42 {dimension_numbers = #tpu.dot_dimension_numbers<[1], [0], [0], [1], [0, 0, 1, 1], [], []>} : vector<8x128xbf16>, vector<128x512xbf16>, vector<8x512xf32> -> vector<8x512xf32>
    %137 = arith.addf %133, %136 : vector<8x512xf32>
    %138 = vector.extract_strided_slice %137 {offsets = [0, 0], sizes = [8, 384], strides = [1, 1]} : vector<8x512xf32> to vector<8x384xf32>
    %139 = arith.negf %138 : vector<8x384xf32>
    %140 = math.exp %139 : vector<8x384xf32>
    %cst_43 = arith.constant 1.000000e+00 : f32
    %141 = vector.broadcast %cst_43 : f32 to vector<8x384xf32>
    %142 = arith.addf %141, %140 : vector<8x384xf32>
    %143 = arith.divf %141, %142 : vector<8x384xf32>
    %144 = vector.extract_strided_slice %143 {offsets = [0, 0], sizes = [8, 128], strides = [1, 1]} : vector<8x384xf32> to vector<8x128xf32>
    %145 = vector.extract_strided_slice %143 {offsets = [0, 128], sizes = [8, 128], strides = [1, 1]} : vector<8x384xf32> to vector<8x128xf32>
    %146 = vector.extract_strided_slice %143 {offsets = [0, 256], sizes = [8, 128], strides = [1, 1]} : vector<8x384xf32> to vector<8x128xf32>
    %147 = vector.extract_strided_slice %137 {offsets = [0, 384], sizes = [8, 128], strides = [1, 1]} : vector<8x512xf32> to vector<8x128xf32>
    %148 = math.tanh %147 : vector<8x128xf32>
    %149 = arith.mulf %145, %127 : vector<8x128xf32>
    %150 = arith.mulf %144, %148 : vector<8x128xf32>
    %151 = arith.addf %149, %150 : vector<8x128xf32>
    %152 = math.tanh %151 : vector<8x128xf32>
    %153 = arith.mulf %146, %152 : vector<8x128xf32>
    %c6_i32 = arith.constant 6 : i32
    %c8_i32_44 = arith.constant 8 : i32
    %154 = arith.muli %c6_i32, %c8_i32_44 : i32
    %155 = tpu.assume_multiple %154, 8 : i32
    %156 = arith.index_cast %155 : i32 to index
    %c0_45 = arith.constant 0 : index
    %157 = vector.load %arg9[%156, %c0_45] : memref<64x512xf32, #tpu.memory_space<vmem>>, vector<8x512xf32>
    %158 = arith.truncf %153 : vector<8x128xf32> to vector<8x128xbf16>
    %c0_46 = arith.constant 0 : index
    %c0_47 = arith.constant 0 : index
    %159 = vector.load %arg2[%c0_46, %c0_47] : memref<128x512xbf16, #tpu.memory_space<vmem>>, vector<128x512xbf16>
    %cst_48 = arith.constant dense<0.000000e+00> : vector<8x512xf32>
    %160 = tpu.matmul %158, %159, %cst_48 {dimension_numbers = #tpu.dot_dimension_numbers<[1], [0], [0], [1], [0, 0, 1, 1], [], []>} : vector<8x128xbf16>, vector<128x512xbf16>, vector<8x512xf32> -> vector<8x512xf32>
    %161 = arith.addf %157, %160 : vector<8x512xf32>
    %162 = vector.extract_strided_slice %161 {offsets = [0, 0], sizes = [8, 384], strides = [1, 1]} : vector<8x512xf32> to vector<8x384xf32>
    %163 = arith.negf %162 : vector<8x384xf32>
    %164 = math.exp %163 : vector<8x384xf32>
    %cst_49 = arith.constant 1.000000e+00 : f32
    %165 = vector.broadcast %cst_49 : f32 to vector<8x384xf32>
    %166 = arith.addf %165, %164 : vector<8x384xf32>
    %167 = arith.divf %165, %166 : vector<8x384xf32>
    %168 = vector.extract_strided_slice %167 {offsets = [0, 0], sizes = [8, 128], strides = [1, 1]} : vector<8x384xf32> to vector<8x128xf32>
    %169 = vector.extract_strided_slice %167 {offsets = [0, 128], sizes = [8, 128], strides = [1, 1]} : vector<8x384xf32> to vector<8x128xf32>
    %170 = vector.extract_strided_slice %167 {offsets = [0, 256], sizes = [8, 128], strides = [1, 1]} : vector<8x384xf32> to vector<8x128xf32>
    %171 = vector.extract_strided_slice %161 {offsets = [0, 384], sizes = [8, 128], strides = [1, 1]} : vector<8x512xf32> to vector<8x128xf32>
    %172 = math.tanh %171 : vector<8x128xf32>
    %173 = arith.mulf %169, %151 : vector<8x128xf32>
    %174 = arith.mulf %168, %172 : vector<8x128xf32>
    %175 = arith.addf %173, %174 : vector<8x128xf32>
    %176 = math.tanh %175 : vector<8x128xf32>
    %177 = arith.mulf %170, %176 : vector<8x128xf32>
    %c7_i32 = arith.constant 7 : i32
    %c8_i32_50 = arith.constant 8 : i32
    %178 = arith.muli %c7_i32, %c8_i32_50 : i32
    %179 = tpu.assume_multiple %178, 8 : i32
    %180 = arith.index_cast %179 : i32 to index
    %c0_51 = arith.constant 0 : index
    %181 = vector.load %arg9[%180, %c0_51] : memref<64x512xf32, #tpu.memory_space<vmem>>, vector<8x512xf32>
    %182 = arith.truncf %177 : vector<8x128xf32> to vector<8x128xbf16>
    %c0_52 = arith.constant 0 : index
    %c0_53 = arith.constant 0 : index
    %183 = vector.load %arg2[%c0_52, %c0_53] : memref<128x512xbf16, #tpu.memory_space<vmem>>, vector<128x512xbf16>
    %cst_54 = arith.constant dense<0.000000e+00> : vector<8x512xf32>
    %184 = tpu.matmul %182, %183, %cst_54 {dimension_numbers = #tpu.dot_dimension_numbers<[1], [0], [0], [1], [0, 0, 1, 1], [], []>} : vector<8x128xbf16>, vector<128x512xbf16>, vector<8x512xf32> -> vector<8x512xf32>
    %185 = arith.addf %181, %184 : vector<8x512xf32>
    %186 = vector.extract_strided_slice %185 {offsets = [0, 0], sizes = [8, 384], strides = [1, 1]} : vector<8x512xf32> to vector<8x384xf32>
    %187 = arith.negf %186 : vector<8x384xf32>
    %188 = math.exp %187 : vector<8x384xf32>
    %cst_55 = arith.constant 1.000000e+00 : f32
    %189 = vector.broadcast %cst_55 : f32 to vector<8x384xf32>
    %190 = arith.addf %189, %188 : vector<8x384xf32>
    %191 = arith.divf %189, %190 : vector<8x384xf32>
    %192 = vector.extract_strided_slice %191 {offsets = [0, 0], sizes = [8, 128], strides = [1, 1]} : vector<8x384xf32> to vector<8x128xf32>
    %193 = vector.extract_strided_slice %191 {offsets = [0, 128], sizes = [8, 128], strides = [1, 1]} : vector<8x384xf32> to vector<8x128xf32>
    %194 = vector.extract_strided_slice %191 {offsets = [0, 256], sizes = [8, 128], strides = [1, 1]} : vector<8x384xf32> to vector<8x128xf32>
    %195 = vector.extract_strided_slice %185 {offsets = [0, 384], sizes = [8, 128], strides = [1, 1]} : vector<8x512xf32> to vector<8x128xf32>
    %196 = math.tanh %195 : vector<8x128xf32>
    %197 = arith.mulf %193, %175 : vector<8x128xf32>
    %198 = arith.mulf %192, %196 : vector<8x128xf32>
    %199 = arith.addf %197, %198 : vector<8x128xf32>
    %200 = math.tanh %199 : vector<8x128xf32>
    %201 = arith.mulf %194, %200 : vector<8x128xf32>
    %c8_i32_56 = arith.constant 8 : i32
    %202 = arith.truncf %201 : vector<8x128xf32> to vector<8x128xbf16>
    %c0_57 = arith.constant 0 : index
    %c0_58 = arith.constant 0 : index
    %203 = vector.load %arg4[%c0_57, %c0_58] : memref<128x128xbf16, #tpu.memory_space<vmem>>, vector<128x128xbf16>
    %cst_59 = arith.constant dense<0.000000e+00> : vector<8x128xf32>
    %204 = tpu.matmul %202, %203, %cst_59 {dimension_numbers = #tpu.dot_dimension_numbers<[1], [0], [0], [1], [0, 0, 1, 1], [], []>} : vector<8x128xbf16>, vector<128x128xbf16>, vector<8x128xf32> -> vector<8x128xf32>
    %c0_60 = arith.constant 0 : index
    %c0_61 = arith.constant 0 : index
    %205 = vector.load %arg5[%c0_60, %c0_61] : memref<1x128xf32, #tpu.memory_space<vmem>>, vector<1x128xf32>
    %206 = vector.broadcast %205 : vector<1x128xf32> to vector<8x128xf32>
    %207 = arith.addf %204, %206 : vector<8x128xf32>
    %cst_62 = arith.constant 0.000000e+00 : f32
    %208 = vector.broadcast %cst_62 : f32 to vector<8x128xf32>
    %209 = arith.cmpf ogt, %207, %208 : vector<8x128xf32>
    %cst_63 = arith.constant 2.000000e-01 : f32
    %210 = vector.broadcast %cst_63 : f32 to vector<8x128xf32>
    %211 = arith.mulf %210, %207 : vector<8x128xf32>
    %212 = arith.select %209, %207, %211 : vector<8x128xi1>, vector<8x128xf32>
    %c0_64 = arith.constant 0 : index
    %c0_65 = arith.constant 0 : index
    %213 = vector.load %arg6[%c0_64, %c0_65] : memref<1x128xf32, #tpu.memory_space<vmem>>, vector<1x128xf32>
    %214 = vector.broadcast %213 : vector<1x128xf32> to vector<8x128xf32>
    %215 = arith.mulf %212, %214 : vector<8x128xf32>
    %cst_66 = arith.constant dense<0.000000e+00> : vector<8xf32>
    %216 = vector.multi_reduction <add>, %215, %cst_66 [1] : vector<8x128xf32> to vector<8xf32>
    %217 = vector.shape_cast %216 : vector<8xf32> to vector<8x1xf32>
    %c0_67 = arith.constant 0 : index
    %c0_68 = arith.constant 0 : index
    %218 = vector.load %arg7[%c0_67, %c0_68] : memref<1x1xf32, #tpu.memory_space<vmem>>, vector<1x1xf32>
    %219 = vector.broadcast %218 : vector<1x1xf32> to vector<8x1xf32>
    %220 = arith.addf %217, %219 : vector<8x1xf32>
    %c0_69 = arith.constant 0 : index
    %c0_70 = arith.constant 0 : index
    %221 = vector.load %arg8[%c0_69, %c0_70] : memref<8x1xf32, #tpu.memory_space<vmem>>, vector<8x1xf32>
    tpu.vector_store %arg8[%c0_69, %c0_70], %220 {strides = array<i32>} : memref<8x1xf32, #tpu.memory_space<vmem>>, vector<8x1xf32>,
    return
  }
}

</mosaic_0001>

<bundles_post_ra>
// kernel: discriminator_forward.1
= control target key start
LH: loop header
LB: loop body
LE: loop exit
PB: predicated region body
PF: predicated region fallthrough
CT: control target
= control target key end

     0   :  { %s2628_s0 = inlined_call_operand.vmem [shape: f32[64,11], index: 0, kind: input, shape index: {}]   ;;  %s2629_s1 = inlined_call_operand.vmem [shape: bf16[11,512], index: 1, kind: input, shape index: {}]   ;;  %s2630_s2 = inlined_call_operand.hbm [shape: bf16[128,512], index: 2, kind: input, shape index: {}]   ;;  %s2631_s3 = inlined_call_operand.vmem [shape: f32[1,512], index: 3, kind: input, shape index: {}]   ;;  %s2632_s4 = inlined_call_operand.vmem [shape: bf16[128,128], index: 4, kind: input, shape index: {}]   ;;  %s2633_s5 = inlined_call_operand.vmem [shape: f32[1,128], index: 5, kind: input, shape index: {}]   ;;  %s2634_s6 = inlined_call_operand.vmem [shape: f32[1,128], index: 6, kind: input, shape index: {}]   ;;  %s2635_s7 = inlined_call_operand.<no memory space> [shape: f32[1,1], index: 7, kind: input, shape index: {}]   ;;  %s2636_s8 = inlined_call_operand.vmem [shape: f32[8,1], index: 8, kind: output, shape index: {}]  }
   0x1   :  { %v13_v0 = vstv %s2635_s7 }
   0x2   :  { %14 = vst [vmem:[#allocation3] sm:$0x1] %v13_v0 }
   0x3   :  { %15 = vsyncpa [#allocation5], 0  ;;  %s1948_s29 = smov [#allocation4]  }
   0x4   :  { %s25_s30 = sshll.u32 %s1948_s29, 4  ;;  %s26_s30 = int_to_ptr.vmem [resolvable:$true] %s25_s30 }
   0x5   :  { %s1934_s9 = scalar_lea.vmem %s26_s30, 4096  ;;  %p1939_p1 = scmp.lt.s32.totalorder %s26_s30, %s26_s30 }
   0x6   :  { %p1935_p0 = scmp.ne.s32.totalorder %s26_s30, %s1934_s9  ;;  %p1940_p2 = scmp.lt.s32.totalorder %s1934_s9, %s1934_s9 }
   0x8   :  { %p1941_p3 = por %p1940_p2, %p1939_p1 }
   0xa   :  { %p1942_p4 = pnand %p1941_p3, %p1935_p0 }
   0xc   :  { %1945 = shalt.err (!%p1942_p4)
}
   0xd   :  { %s1949_s10 = smov 256   ;;  %s1950_s11 = smov 16  }
   0xe   :  { %31 = dma.hbm_to_vmem [thread:$0]  %s2630_s2, 4096, %s26_s30, [#allocation5], %s1949_s10, %s1949_s10, %s1950_s11  }
   0xf   :  { %1946 = dma.done.wait [#allocation5], 4096  }
  0x10   :  { %1947 = vsyncadd [#allocation5], 4294963200  ;;  %vm113_vm0 = vcmask 1044480   ;;  %v2637_v1 = vmov 0   ;;  %vm114_vm1 = vcmask 1045504   ;;  %v1952_v2 = vmov 65535  }
  0x11   :  { %161 = vmatprep.mubr.bf16.mxu0 %v2637_v1  ;;  %234 = vmatprep.mubr.bf16.mxu1 %v2637_v1  ;;  %v115_v3 = vsel %vm113_vm0, 4294967295, %v1952_v2  ;;  %v1704_v5 = vld [vmem:[%s2629_s1 + $0x4] ss:$16 sps:$4 sm:$0x3f]   ;;  %v47_v12 = vld [vmem:[%s2628_s0 + $0x8] sm:$0xff]  ;;  %vm100_vm2 = vcmask 89088   ;;  %v64_v57 = vlaneseq }
  0x12   :  { %v116_v4 = vsel %vm114_vm1, %v115_v3, 0  ;;  %v1706_v6 = vld [vmem:[%s2629_s1 + $0xc] ss:$16 sps:$4 sm:$0x3f]   ;;  %v46_v11 = vld [vmem:[%s2628_s0] sm:$0xff]  ;;  %v48_v24 = vld [vmem:[%s2628_s0 + $0x10] sm:$0xff] }
  0x13   :  { %v121_v7 = vand.u32 %v1704_v5, %v116_v4  ;;  %v1708_v8 = vld [vmem:[%s2629_s1] ss:$16 sps:$4 sm:$0x3f]   ;;  %v1709_v9 = vld [vmem:[%s2629_s1 + $0x8] ss:$16 sps:$4 sm:$0x3f]   ;;  %v127_v10 = vand.u32 %v1706_v6, %v116_v4  ;;  %v54_v16 = vpack.c.bf16 %v47_v12, %v46_v11 }
  0x14   :  { %v118_v13 = vand.u32 %v1708_v8, %v116_v4  ;;  %v124_v14 = vand.u32 %v1709_v9, %v116_v4  ;;  %v2026_v15 = vld [vmem:[#allocation4 + $0xe4] ss:$16 sps:$4 sm:$0xff]   ;;  %v2028_v17 = vld [vmem:[#allocation4 + $0xec] ss:$16 sps:$4 sm:$0xff]   ;;  %v2030_v18 = vld [vmem:[#allocation4 + $0xe0] ss:$16 sps:$4 sm:$0xff]  }
  0x15   :  { %143 = vmatprep.subr.bf16.mxu0 %v121_v7  ;;  %216 = vmatprep.subr.bf16.mxu1 %v127_v10  ;;  %v2032_v19 = vld [vmem:[#allocation4 + $0xe8] ss:$16 sps:$4 sm:$0xff]   ;;  %v2036_v20 = vld [vmem:[#allocation4 + $0xc4] ss:$16 sps:$4 sm:$0xff]   ;;  %v2038_v21 = vld [vmem:[#allocation4 + $0xcc] ss:$16 sps:$4 sm:$0xff]  }
  0x16   :  { %144 = vmatpush1.bf16.msra.mxu0 %v118_v13  ;;  %217 = vmatpush1.bf16.msra.mxu1 %v124_v14  ;;  %v2040_v22 = vld [vmem:[#allocation4 + $0xc0] ss:$16 sps:$4 sm:$0xff]   ;;  %v2044_v23 = vld [vmem:[#allocation4 + $0xc8] ss:$16 sps:$4 sm:$0xff]   ;;  %v2056_v26 = vld [vmem:[#allocation4 + $0xa4] ss:$16 sps:$4 sm:$0xff]  }
  0x17   :  { %506 = vmatprep.subr.bf16.mxu0 %v2026_v15  ;;  %547 = vmatprep.subr.bf16.mxu1 %v2028_v17  ;;  %v49_v25 = vld [vmem:[%s2628_s0 + $0x18] sm:$0xff]  ;;  %v2064_v29 = vld [vmem:[#allocation4 + $0xa0] ss:$16 sps:$4 sm:$0xff]   ;;  %v51_v36 = vld [vmem:[%s2628_s0 + $0x28] sm:$0xff]  ;;  %v65_v58 = vshrl.u32 %v64_v57, 7  ;;  %vm1954_vm3 = vmmov 0  }
  0x18   :  { %v2058_v27 = vld [vmem:[#allocation4 + $0xac] ss:$16 sps:$4 sm:$0xff]   ;;  %v55_v28 = vpack.c.bf16 %v49_v25, %v48_v24  ;;  %v2066_v30 = vld [vmem:[#allocation4 + $0xa8] ss:$16 sps:$4 sm:$0xff]   ;;  %v2070_v31 = vld [vmem:[#allocation4 + $0x84] ss:$16 sps:$4 sm:$0xff]  }
  0x19   :  { %1593 = vmatmul.mubr.msk.bf16.vlgmr.msra.gmra.mxu0 %vm100_vm2, %v54_v16  ;;  %1597 = vmatmul.mubr.msk.bf16.vlgmr.msra.gmra.mxu1 %vm100_vm2, %v54_v16  ;;  %v2072_v32 = vld [vmem:[#allocation4 + $0x8c] ss:$16 sps:$4 sm:$0xff]   ;;  %v2074_v33 = vld [vmem:[#allocation4 + $0x80] ss:$16 sps:$4 sm:$0xff]   ;;  %v2076_v34 = vld [vmem:[#allocation4 + $0x88] ss:$16 sps:$4 sm:$0xff]  }
  0x1a   :  { %507 = vmatpush1.bf16.msra.mxu0 %v2030_v18  ;;  %548 = vmatpush1.bf16.msra.mxu1 %v2032_v19  ;;  %v50_v35 = vld [vmem:[%s2628_s0 + $0x20] sm:$0xff]  ;;  %v2100_v41 = vld [vmem:[#allocation4 + $0x68] ss:$16 sps:$4 sm:$0xff]   ;;  %v52_v46 = vld [vmem:[%s2628_s0 + $0x30] sm:$0xff]  ;;  %v74_v59 = vsub.s32 2, %v65_v58  ;;  %v66_v60 = vsub.s32 0, %v65_v58 }
  0x1b   :  { %508 = vmatprep.subr.bf16.mxu0 %v2036_v20  ;;  %549 = vmatprep.subr.bf16.mxu1 %v2038_v21  ;;  %v2088_v37 = vld [vmem:[#allocation4 + $0x64] ss:$16 sps:$4 sm:$0xff]   ;;  %v2092_v38 = vld [vmem:[#allocation4 + $0x6c] ss:$16 sps:$4 sm:$0xff]   ;;  %v56_v39 = vpack.c.bf16 %v51_v36, %v50_v35  ;;  %v2096_v40 = vld [vmem:[#allocation4 + $0x60] ss:$16 sps:$4 sm:$0xff]  }
  0x1c   :  { %171 = vmatprep.mubr.bf16.mxu0 %v2637_v1  ;;  %244 = vmatprep.mubr.bf16.mxu1 %v2637_v1  ;;  %v2104_v42 = vld [vmem:[#allocation4 + $0x44] ss:$16 sps:$4 sm:$0xff]   ;;  %v2106_v43 = vld [vmem:[#allocation4 + $0x4c] ss:$16 sps:$4 sm:$0xff]   ;;  %v2108_v44 = vld [vmem:[#allocation4 + $0x40] ss:$16 sps:$4 sm:$0xff]  }
  0x1d   :  { %v2112_v45 = vld [vmem:[#allocation4 + $0x48] ss:$16 sps:$4 sm:$0xff]   ;;  %v2122_v48 = vld [vmem:[#allocation4 + $0x24] ss:$16 sps:$4 sm:$0xff]   ;;  %v2126_v49 = vld [vmem:[#allocation4 + $0x2c] ss:$16 sps:$4 sm:$0xff]  }
  0x1e   :  { %509 = vmatpush1.bf16.msra.mxu0 %v2040_v22  ;;  %550 = vmatpush1.bf16.msra.mxu1 %v2044_v23  ;;  %v53_v47 = vld [vmem:[%s2628_s0 + $0x38] sm:$0xff]  ;;  %v2130_v50 = vld [vmem:[#allocation4 + $0x20] ss:$16 sps:$4 sm:$0xff]   ;;  %v78_v61 = vsub.s32 3, %v65_v58  ;;  %v70_v3 = vsub.s32 1, %v65_v58  ;;  %vm1575_vm5 = vcmask 7168  }
  0x1f   :  { %510 = vmatprep.subr.bf16.mxu0 %v2056_v26  ;;  %551 = vmatprep.subr.bf16.mxu1 %v2058_v27  ;;  %v2132_v51 = vld [vmem:[#allocation4 + $0x28] ss:$16 sps:$4 sm:$0xff]   ;;  %v57_v52 = vpack.c.bf16 %v53_v47, %v52_v46  ;;  %v2134_v53 = vld [vmem:[#allocation4 + $0x4] ss:$16 sps:$4 sm:$0xff]   ;;  %v2136_v54 = vld [vmem:[#allocation4 + $0xc] ss:$16 sps:$4 sm:$0xff]  }
  0x20   :  { %v2146_v55 = vld [vmem:[#allocation4] ss:$16 sps:$4 sm:$0xff]   ;;  %v2148_v56 = vld [vmem:[#allocation4 + $0x8] ss:$16 sps:$4 sm:$0xff]  }
  0x21   :  { %1594 = vmatmul.mubr.msk.bf16.gmra.mxu0 %vm100_vm2, %v55_v28  ;;  %1598 = vmatmul.mubr.msk.bf16.gmra.mxu1 %vm100_vm2, %v55_v28  ;;  %v62_v62 = vld [vmem:[%s2631_s3] sm:$0xf] }
  0x22   :  { %511 = vmatpush1.bf16.msra.mxu0 %v2064_v29  ;;  %552 = vmatpush1.bf16.msra.mxu1 %v2066_v30  ;;  %v2201_v2 = vrot.slane %v62_v62, %v74_v59  ;;  %v67_v6 = vrot.slane %v62_v62, %v66_v60  ;;  %v2207_v7 = vrot.slane %v62_v62, %v78_v61 }
  0x23   :  { %512 = vmatprep.subr.bf16.mxu0 %v2070_v31  ;;  %553 = vmatprep.subr.bf16.mxu1 %v2072_v32  ;;  %v71_v10 = vrot.slane %v62_v62, %v70_v3 }
  0x24   :  { %181 = vmatprep.mubr.bf16.mxu0 %v2637_v1  ;;  %254 = vmatprep.mubr.bf16.mxu1 %v2637_v1 }
  0x26   :  { %513 = vmatpush1.bf16.msra.mxu0 %v2074_v33  ;;  %554 = vmatpush1.bf16.msra.mxu1 %v2076_v34 }
  0x27   :  { %514 = vmatprep.subr.bf16.mxu0 %v2088_v37  ;;  %555 = vmatprep.subr.bf16.mxu1 %v2092_v38 }
  0x29   :  { %1595 = vmatmul.mubr.msk.bf16.gmra.mxu0 %vm100_vm2, %v56_v39  ;;  %1599 = vmatmul.mubr.msk.bf16.gmra.mxu1 %vm100_vm2, %v56_v39 }
  0x2a   :  { %515 = vmatpush1.bf16.msra.mxu0 %v2096_v40  ;;  %556 = vmatpush1.bf16.msra.mxu1 %v2100_v41 }
  0x2b   :  { %516 = vmatprep.subr.bf16.mxu0 %v2104_v42  ;;  %557 = vmatprep.subr.bf16.mxu1 %v2106_v43 }
  0x2c   :  { %191 = vmatprep.mubr.bf16.mxu0 %v2637_v1  ;;  %264 = vmatprep.mubr.bf16.mxu1 %v2637_v1 }
  0x2e   :  { %517 = vmatpush1.bf16.msra.mxu0 %v2108_v44  ;;  %558 = vmatpush1.bf16.msra.mxu1 %v2112_v45 }
  0x2f   :  { %518 = vmatprep.subr.bf16.mxu0 %v2122_v48  ;;  %559 = vmatprep.subr.bf16.mxu1 %v2126_v49 }
  0x31   :  { %1596 = vmatmul.mubr.msk.bf16.gmra.mxu0 %vm100_vm2, %v57_v52  ;;  %1600 = vmatmul.mubr.msk.bf16.gmra.mxu1 %vm100_vm2, %v57_v52 }
  0x32   :  { %519 = vmatpush1.bf16.msra.mxu0 %v2130_v50  ;;  %560 = vmatpush1.bf16.msra.mxu1 %v2132_v51 }
  0x33   :  { %520 = vmatprep.subr.bf16.mxu0 %v2134_v53  ;;  %561 = vmatprep.subr.bf16.mxu1 %v2136_v54 }
  0x34   :  { %538 = vmatprep.mubr.bf16.mxu0 %v2637_v1  ;;  %579 = vmatprep.mubr.bf16.mxu1 %v2637_v1 }
  0x36   :  { %521 = vmatpush1.bf16.msra.mxu0 %v2146_v55  ;;  %562 = vmatpush1.bf16.msra.mxu1 %v2148_v56 }
  0x37   :  { %624 = vmatprep.subr.bf16.mxu0 %v2026_v15  ;;  %665 = vmatprep.subr.bf16.mxu1 %v2028_v17 }
  0x39   :  { %539 = vmatmul.mubr.bf16.vlgmr.msra.gmra.mxu0 %v2637_v1  ;;  %580 = vmatmul.mubr.bf16.vlgmr.msra.gmra.mxu1 %v2637_v1 }
  0x3a   :  { %625 = vmatpush1.bf16.msra.mxu0 %v2030_v18  ;;  %666 = vmatpush1.bf16.msra.mxu1 %v2032_v19 }
  0x3b   :  { %626 = vmatprep.subr.bf16.mxu0 %v2036_v20  ;;  %667 = vmatprep.subr.bf16.mxu1 %v2038_v21 }
  0x3c   :  { %656 = vmatprep.mubr.bf16.mxu0 %v2637_v1  ;;  %697 = vmatprep.mubr.bf16.mxu1 %v2637_v1 }
  0x3e   :  { %627 = vmatpush1.bf16.msra.mxu0 %v2040_v22  ;;  %668 = vmatpush1.bf16.msra.mxu1 %v2044_v23 }
  0x3f   :  { %628 = vmatprep.subr.bf16.mxu0 %v2056_v26  ;;  %669 = vmatprep.subr.bf16.mxu1 %v2058_v27 }
  0x42   :  { %629 = vmatpush1.bf16.msra.mxu0 %v2064_v29  ;;  %670 = vmatpush1.bf16.msra.mxu1 %v2066_v30 }
  0x43   :  { %630 = vmatprep.subr.bf16.mxu0 %v2070_v31  ;;  %671 = vmatprep.subr.bf16.mxu1 %v2072_v32 }
  0x46   :  { %631 = vmatpush1.bf16.msra.mxu0 %v2074_v33  ;;  %672 = vmatpush1.bf16.msra.mxu1 %v2076_v34 }
  0x47   :  { %632 = vmatprep.subr.bf16.mxu0 %v2088_v37  ;;  %673 = vmatprep.subr.bf16.mxu1 %v2092_v38 }
  0x4a   :  { %633 = vmatpush1.bf16.msra.mxu0 %v2096_v40  ;;  %674 = vmatpush1.bf16.msra.mxu1 %v2100_v41 }
  0x4b   :  { %634 = vmatprep.subr.bf16.mxu0 %v2104_v42  ;;  %675 = vmatprep.subr.bf16.mxu1 %v2106_v43 }
  0x4e   :  { %635 = vmatpush1.bf16.msra.mxu0 %v2108_v44  ;;  %676 = vmatpush1.bf16.msra.mxu1 %v2112_v45 }
  0x4f   :  { %636 = vmatprep.subr.bf16.mxu0 %v2122_v48  ;;  %677 = vmatprep.subr.bf16.mxu1 %v2126_v49 }
  0x52   :  { %637 = vmatpush1.bf16.msra.mxu0 %v2130_v50  ;;  %678 = vmatpush1.bf16.msra.mxu1 %v2132_v51 }
  0x53   :  { %638 = vmatprep.subr.bf16.mxu0 %v2134_v53  ;;  %679 = vmatprep.subr.bf16.mxu1 %v2136_v54 }
  0x56   :  { %639 = vmatpush1.bf16.msra.mxu0 %v2146_v55  ;;  %680 = vmatpush1.bf16.msra.mxu1 %v2148_v56 }
  0x57   :  { %742 = vmatprep.subr.bf16.mxu0 %v2026_v15  ;;  %783 = vmatprep.subr.bf16.mxu1 %v2028_v17 }
  0xd9   :  { %v2197_v63 = vpop.f32.mrf.mxu0  ;;  %v2199_v0 = vpop.f32.mrf.mxu1 }
  0xdb   :  { %v2203_v4 = vpop.f32.mrf.mxu0  ;;  %v2205_v5 = vpop.f32.mrf.mxu1 }
  0xdd   :  { %v167_v8 = vpop.f32.mrf.mxu0  ;;  %v240_v9 = vpop.f32.mrf.mxu1 }
  0xde   :  { %v2209_v11 = vadd.f32 %v167_v8, %v67_v6  ;;  %v2212_v12 = vadd.f32 %v240_v9, %v2201_v2 }
  0xdf   :  { %v169_v13 = vpop.f32.mrf.mxu0  ;;  %v242_v14 = vpop.f32.mrf.mxu1 }
  0xe0   :  { %v2214_v16 = vadd.f32 %v169_v13, %v71_v10  ;;  %v2217_v24 = vadd.f32 %v242_v14, %v2207_v7 }
  0xe1   :  { %v173_v25 = vpop.f32.mrf.mxu0  ;;  %v246_v28 = vpop.f32.mrf.mxu1 }
  0xe2   :  { %v2219_v35 = vadd.f32 %v173_v25, %v67_v6  ;;  %v2222_v36 = vadd.f32 %v246_v28, %v2201_v2 }
  0xe3   :  { %v175_v39 = vpop.f32.mrf.mxu0  ;;  %v248_v46 = vpop.f32.mrf.mxu1 }
  0xe4   :  { %v2224_v47 = vadd.f32 %v175_v39, %v71_v10  ;;  %v2227_v52 = vadd.f32 %v248_v46, %v2207_v7 }
  0xe5   :  { %v177_v57 = vpop.f32.mrf.mxu0  ;;  %v250_v58 = vpop.f32.mrf.mxu1 }
  0xe6   :  { %2639 = vst [vmem:[#allocation7_spill] sm:$0xff] %v2227_v52  ;;  %v2229_v59 = vadd.f32 %v177_v57, %v67_v6  ;;  %v2232_v60 = vadd.f32 %v250_v58, %v2201_v2 }
  0xe7   :  { %v179_v61 = vpop.f32.mrf.mxu0  ;;  %v252_v62 = vpop.f32.mrf.mxu1 }
  0xe8   :  { %2640 = vst [vmem:[#allocation8_spill] sm:$0xff] %v2229_v59  ;;  %2641 = vst [vmem:[#allocation9_spill] sm:$0xff] %v2232_v60  ;;  %v2234_v3 = vadd.f32 %v179_v61, %v71_v10  ;;  %v2237_v8 = vadd.f32 %v252_v62, %v2207_v7 }
  0xe9   :  { %v183_v9 = vpop.f32.mrf.mxu0  ;;  %v256_v13 = vpop.f32.mrf.mxu1 }
  0xea   :  { %2642 = vst [vmem:[#allocation10_spill] sm:$0xff] %v2234_v3  ;;  %2643 = vst [vmem:[#allocation11_spill] sm:$0xff] %v2237_v8  ;;  %v2239_v14 = vadd.f32 %v183_v9, %v67_v6  ;;  %v2242_v25 = vadd.f32 %v256_v13, %v2201_v2 }
  0xeb   :  { %v185_v28 = vpop.f32.mrf.mxu0  ;;  %v258_v39 = vpop.f32.mrf.mxu1 }
  0xec   :  { %2644 = vst [vmem:[#allocation12_spill] sm:$0xff] %v2239_v14  ;;  %2645 = vst [vmem:[#allocation13_spill] sm:$0xff] %v2242_v25  ;;  %v2244_v46 = vadd.f32 %v185_v28, %v71_v10  ;;  %v2247_v57 = vadd.f32 %v258_v39, %v2207_v7 }
  0xed   :  { %v187_v58 = vpop.f32.mrf.mxu0  ;;  %v260_v61 = vpop.f32.mrf.mxu1 }
  0xee   :  { %2646 = vst [vmem:[#allocation14_spill] sm:$0xff] %v2244_v46  ;;  %2647 = vst [vmem:[#allocation15_spill] sm:$0xff] %v2247_v57  ;;  %v2249_v1 = vadd.f32 %v187_v58, %v67_v6  ;;  %v2252_v62 = vadd.f32 %v260_v61, %v2201_v2 }
  0xef   :  { %v189_v8 = vpop.f32.mrf.mxu0  ;;  %v262_v9 = vpop.f32.mrf.mxu1 }
  0xf0   :  { %2648 = vst [vmem:[#allocation16_spill] sm:$0xff] %v2249_v1  ;;  %2649 = vst [vmem:[#allocation17_spill] sm:$0xff] %v2252_v62  ;;  %v2254_v14 = vadd.f32 %v189_v8, %v71_v10  ;;  %v2257_v13 = vadd.f32 %v262_v9, %v2207_v7 }
  0xf1   :  { %v193_v25 = vpop.f32.mrf.mxu0  ;;  %v266_v28 = vpop.f32.mrf.mxu1 }
  0xf2   :  { %2650 = vst [vmem:[#allocation18_spill] sm:$0xff] %v2254_v14  ;;  %2651 = vst [vmem:[#allocation19_spill] sm:$0xff] %v2257_v13  ;;  %v2259_v46 = vadd.f32 %v193_v25, %v67_v6  ;;  %v2262_v39 = vadd.f32 %v266_v28, %v2201_v2 }
  0xf3   :  { %v195_v57 = vpop.f32.mrf.mxu0  ;;  %v268_v58 = vpop.f32.mrf.mxu1 }
  0xf4   :  { %2652 = vst [vmem:[#allocation20_spill] sm:$0xff] %v2259_v46  ;;  %2653 = vst [vmem:[#allocation21_spill] sm:$0xff] %v2262_v39  ;;  %v2264_v1 = vadd.f32 %v195_v57, %v71_v10  ;;  %v2267_v61 = vadd.f32 %v268_v58, %v2207_v7  ;;  %v164_v46 = vadd.f32 %v2197_v63, %v67_v6 }
  0xf5   :  { %v197_v62 = vpop.f32.mrf.mxu0  ;;  %v270_v8 = vpop.f32.mrf.mxu1  ;;  %v166_v58 = vadd.f32 %v2203_v4, %v71_v10 }
  0xf6   :  { %2654 = vst [vmem:[#allocation22_spill] sm:$0xff] %v2264_v1  ;;  %2655 = vst [vmem:[#allocation23_spill] sm:$0xff] %v2267_v61  ;;  %v2269_v14 = vadd.f32 %v197_v62, %v67_v6  ;;  %v2272_v9 = vadd.f32 %v270_v8, %v2201_v2  ;;  %v237_v6 = vadd.f32 %v2199_v0, %v2201_v2 }
  0xf7   :  { %v199_v13 = vpop.f32.mrf.mxu0  ;;  %v272_v25 = vpop.f32.mrf.mxu1 }
  0xf8   :  { %2656 = vst [vmem:[#allocation24_spill] sm:$0xff] %v2269_v14  ;;  %2657 = vst [vmem:[#allocation25_spill] sm:$0xff] %v2272_v9  ;;  %v2275_v28 = vadd.f32 %v199_v13, %v71_v10  ;;  %v2278_v39 = vadd.f32 %v272_v25, %v2207_v7  ;;  %v239_v25 = vadd.f32 %v2205_v5, %v2207_v7 }
  0xf9   :  { %v540_v57 = vpop.f32.mrf.mxu0  ;;  %v581_v1 = vpop.f32.mrf.mxu1 }
  0xfa   :  { %v588_v61 = vadd.f32 %v540_v57, %v164_v46  ;;  %v590_v13 = vadd.f32 %v581_v1, %v237_v6 }
  0xfb   :  { %v542_v60 = vpop.f32.mrf.mxu0  ;;  %v583_v62 = vpop.f32.mrf.mxu1 }
  0xfc   :  { %v1633_v14 = vmul.f32 -1.442695, %v588_v61  ;;  %v589_v3 = vadd.f32 %v542_v60, %v166_v58  ;;  %v1635_v4 = vmul.f32 -1.442695, %v590_v13  ;;  %v591_v46 = vadd.f32 %v583_v62, %v239_v25 }
  0xfd   :  { %v544_v8 = vpop.f32.mrf.mxu0  ;;  %v585_v9 = vpop.f32.mrf.mxu1 }
  0xfe   :  { %1766 = vpow2.f32 %v1633_v14  ;;  %v1634_v59 = vmul.f32 -1.442695, %v589_v3  ;;  %v2658_v8 = vmov 0  }
  0xff   :  { %v545_v52 = vpop.f32.mrf.mxu0  ;;  %v586_v63 = vpop.f32.mrf.mxu1 }
 0x100   :  { %1768 = vpow2.f32 %v1634_v59 }
 0x101   :  { %1770 = vpow2.f32 %v1635_v4 }
 0x10b   :  { %v1767_v10 = vpop.eup %1766 }
 0x10c   :  { %v601_v57 = vadd.f32 1.0, %v1767_v10 }
 0x10d   :  { %v1769_v61 = vpop.eup %1768 }
 0x10e   :  { %1772 = vrcp.f32 %v601_v57  ;;  %v602_v60 = vadd.f32 1.0, %v1769_v61  ;;  %v1771_v52 = vpop.eup %1770 }
 0x10f   :  { %1774 = vtanh.f32 %v591_v46  ;;  %v603_v9 = vadd.f32 1.0, %v1771_v52 }
 0x110   :  { %1776 = vrcp.f32 %v602_v60 }
 0x111   :  { %1778 = vrcp.f32 %v603_v9 }
 0x11b   :  { %v1773_v3 = vpop.eup %1772 }
 0x11c   :  { %v1775_v59 = vpop.eup %1774 }
 0x11d   :  { %v1777_v14 = vpop.eup %1776  ;;  %v612_v1 = vmul.f32 %v1775_v59, %v1773_v3 }
 0x11e   :  { %v611_v0 = vmul.f32 0.0, %v1777_v14  ;;  %v1779_v5 = vpop.eup %1778 }
 0x120   :  { %v2285_v2 = vadd.f32 %v612_v1, %v611_v0 }
 0x122   :  { %1780 = vtanh.f32 %v2285_v2 }
 0x12f   :  { %v1781_v7 = vpop.eup %1780 }
 0x130   :  { %v615_v58 = vmul.f32 %v1781_v7, %v1779_v5 }
 0x132   :  { %v623_v62 = vpack.c.bf16 %v615_v58, %v615_v58 }
 0x134   :  { %657 = vmatmul.mubr.bf16.vlgmr.msra.gmra.mxu0 %v623_v62  ;;  %698 = vmatmul.mubr.bf16.vlgmr.msra.gmra.mxu1 %v623_v62 }
 0x135   :  { %743 = vmatpush1.bf16.msra.mxu0 %v2030_v18  ;;  %784 = vmatpush1.bf16.msra.mxu1 %v2032_v19 }
 0x136   :  { %744 = vmatprep.subr.bf16.mxu0 %v2036_v20  ;;  %785 = vmatprep.subr.bf16.mxu1 %v2038_v21 }
 0x137   :  { %774 = vmatprep.mubr.bf16.mxu0 %v2658_v8  ;;  %815 = vmatprep.mubr.bf16.mxu1 %v2658_v8 }
 0x139   :  { %745 = vmatpush1.bf16.msra.mxu0 %v2040_v22  ;;  %786 = vmatpush1.bf16.msra.mxu1 %v2044_v23 }
 0x13a   :  { %746 = vmatprep.subr.bf16.mxu0 %v2056_v26  ;;  %787 = vmatprep.subr.bf16.mxu1 %v2058_v27 }
 0x13d   :  { %747 = vmatpush1.bf16.msra.mxu0 %v2064_v29  ;;  %788 = vmatpush1.bf16.msra.mxu1 %v2066_v30 }
 0x13e   :  { %748 = vmatprep.subr.bf16.mxu0 %v2070_v31  ;;  %789 = vmatprep.subr.bf16.mxu1 %v2072_v32 }
 0x141   :  { %749 = vmatpush1.bf16.msra.mxu0 %v2074_v33  ;;  %790 = vmatpush1.bf16.msra.mxu1 %v2076_v34 }
 0x142   :  { %750 = vmatprep.subr.bf16.mxu0 %v2088_v37  ;;  %791 = vmatprep.subr.bf16.mxu1 %v2092_v38 }
 0x145   :  { %751 = vmatpush1.bf16.msra.mxu0 %v2096_v40  ;;  %792 = vmatpush1.bf16.msra.mxu1 %v2100_v41 }
 0x146   :  { %752 = vmatprep.subr.bf16.mxu0 %v2104_v42  ;;  %793 = vmatprep.subr.bf16.mxu1 %v2106_v43 }
 0x149   :  { %753 = vmatpush1.bf16.msra.mxu0 %v2108_v44  ;;  %794 = vmatpush1.bf16.msra.mxu1 %v2112_v45 }
 0x14a   :  { %754 = vmatprep.subr.bf16.mxu0 %v2122_v48  ;;  %795 = vmatprep.subr.bf16.mxu1 %v2126_v49 }
 0x14d   :  { %755 = vmatpush1.bf16.msra.mxu0 %v2130_v50  ;;  %796 = vmatpush1.bf16.msra.mxu1 %v2132_v51 }
 0x14e   :  { %756 = vmatprep.subr.bf16.mxu0 %v2134_v53  ;;  %797 = vmatprep.subr.bf16.mxu1 %v2136_v54 }
 0x151   :  { %757 = vmatpush1.bf16.msra.mxu0 %v2146_v55  ;;  %798 = vmatpush1.bf16.msra.mxu1 %v2148_v56 }
 0x152   :  { %860 = vmatprep.subr.bf16.mxu0 %v2026_v15  ;;  %901 = vmatprep.subr.bf16.mxu1 %v2028_v17 }
 0x1f4   :  { %v658_v63 = vpop.f32.mrf.mxu0  ;;  %v699_v6 = vpop.f32.mrf.mxu1 }
 0x1f5   :  { %v706_v13 = vadd.f32 %v658_v63, %v2209_v11  ;;  %v708_v59 = vadd.f32 %v699_v6, %v2212_v12 }
 0x1f6   :  { %v660_v25 = vpop.f32.mrf.mxu0  ;;  %v701_v4 = vpop.f32.mrf.mxu1 }
 0x1f7   :  { %v1636_v10 = vmul.f32 -1.442695, %v706_v13  ;;  %v707_v46 = vadd.f32 %v660_v25, %v2214_v16  ;;  %v1638_v14 = vmul.f32 -1.442695, %v708_v59  ;;  %v709_v9 = vadd.f32 %v701_v4, %v2217_v24 }
 0x1f8   :  { %v662_v57 = vpop.f32.mrf.mxu0  ;;  %v703_v61 = vpop.f32.mrf.mxu1 }
 0x1f9   :  { %1782 = vpow2.f32 %v1636_v10  ;;  %v1637_v60 = vmul.f32 -1.442695, %v707_v46 }
 0x1fa   :  { %v663_v52 = vpop.f32.mrf.mxu0  ;;  %v704_v3 = vpop.f32.mrf.mxu1 }
 0x1fb   :  { %1784 = vpow2.f32 %v1637_v60 }
 0x1fc   :  { %1786 = vpow2.f32 %v1638_v14 }
 0x1fd   :  { %1788 = vtanh.f32 %v709_v9 }
 0x206   :  { %v1783_v0 = vpop.eup %1782 }
 0x207   :  { %v719_v1 = vadd.f32 1.0, %v1783_v0 }
 0x208   :  { %v1785_v11 = vpop.eup %1784 }
 0x209   :  { %1790 = vrcp.f32 %v719_v1  ;;  %v720_v5 = vadd.f32 1.0, %v1785_v11  ;;  %v1787_v16 = vpop.eup %1786 }
 0x20a   :  { %v1789_v7 = vpop.eup %1788  ;;  %v721_v13 = vadd.f32 1.0, %v1787_v16  ;;  %v2659_v16 = vld [vmem:[#allocation7_spill] sm:$0xff] }
 0x20b   :  { %1792 = vrcp.f32 %v720_v5 }
 0x20c   :  { %1794 = vrcp.f32 %v721_v13 }
 0x216   :  { %v1791_v58 = vpop.eup %1790 }
 0x217   :  { %v730_v62 = vmul.f32 %v1791_v58, %v1789_v7 }
 0x218   :  { %v1793_v63 = vpop.eup %1792 }
 0x219   :  { %v729_v25 = vmul.f32 %v1793_v63, %v2285_v2  ;;  %v1795_v24 = vpop.eup %1794 }
 0x21b   :  { %v2327_v12 = vadd.f32 %v730_v62, %v729_v25 }
 0x21d   :  { %1796 = vtanh.f32 %v2327_v12 }
 0x22a   :  { %v1797_v6 = vpop.eup %1796 }
 0x22b   :  { %v733_v4 = vmul.f32 %v1797_v6, %v1795_v24 }
 0x22d   :  { %v741_v10 = vpack.c.bf16 %v733_v4, %v733_v4 }
 0x22f   :  { %775 = vmatmul.mubr.bf16.vlgmr.msra.gmra.mxu0 %v741_v10  ;;  %816 = vmatmul.mubr.bf16.vlgmr.msra.gmra.mxu1 %v741_v10 }
 0x230   :  { %861 = vmatpush1.bf16.msra.mxu0 %v2030_v18  ;;  %902 = vmatpush1.bf16.msra.mxu1 %v2032_v19 }
 0x231   :  { %862 = vmatprep.subr.bf16.mxu0 %v2036_v20  ;;  %903 = vmatprep.subr.bf16.mxu1 %v2038_v21 }
 0x232   :  { %892 = vmatprep.mubr.bf16.mxu0 %v2658_v8  ;;  %933 = vmatprep.mubr.bf16.mxu1 %v2658_v8 }
 0x234   :  { %863 = vmatpush1.bf16.msra.mxu0 %v2040_v22  ;;  %904 = vmatpush1.bf16.msra.mxu1 %v2044_v23 }
 0x235   :  { %864 = vmatprep.subr.bf16.mxu0 %v2056_v26  ;;  %905 = vmatprep.subr.bf16.mxu1 %v2058_v27 }
 0x238   :  { %865 = vmatpush1.bf16.msra.mxu0 %v2064_v29  ;;  %906 = vmatpush1.bf16.msra.mxu1 %v2066_v30 }
 0x239   :  { %866 = vmatprep.subr.bf16.mxu0 %v2070_v31  ;;  %907 = vmatprep.subr.bf16.mxu1 %v2072_v32 }
 0x23c   :  { %867 = vmatpush1.bf16.msra.mxu0 %v2074_v33  ;;  %908 = vmatpush1.bf16.msra.mxu1 %v2076_v34 }
 0x23d   :  { %868 = vmatprep.subr.bf16.mxu0 %v2088_v37  ;;  %909 = vmatprep.subr.bf16.mxu1 %v2092_v38 }
 0x240   :  { %869 = vmatpush1.bf16.msra.mxu0 %v2096_v40  ;;  %910 = vmatpush1.bf16.msra.mxu1 %v2100_v41 }
 0x241   :  { %870 = vmatprep.subr.bf16.mxu0 %v2104_v42  ;;  %911 = vmatprep.subr.bf16.mxu1 %v2106_v43 }
 0x244   :  { %871 = vmatpush1.bf16.msra.mxu0 %v2108_v44  ;;  %912 = vmatpush1.bf16.msra.mxu1 %v2112_v45 }
 0x245   :  { %872 = vmatprep.subr.bf16.mxu0 %v2122_v48  ;;  %913 = vmatprep.subr.bf16.mxu1 %v2126_v49 }
 0x248   :  { %873 = vmatpush1.bf16.msra.mxu0 %v2130_v50  ;;  %914 = vmatpush1.bf16.msra.mxu1 %v2132_v51 }
 0x249   :  { %874 = vmatprep.subr.bf16.mxu0 %v2134_v53  ;;  %915 = vmatprep.subr.bf16.mxu1 %v2136_v54 }
 0x24c   :  { %875 = vmatpush1.bf16.msra.mxu0 %v2146_v55  ;;  %916 = vmatpush1.bf16.msra.mxu1 %v2148_v56 }
 0x24d   :  { %978 = vmatprep.subr.bf16.mxu0 %v2026_v15  ;;  %1019 = vmatprep.subr.bf16.mxu1 %v2028_v17 }
 0x2ef   :  { %v776_v2 = vpop.f32.mrf.mxu0  ;;  %v817_v46 = vpop.f32.mrf.mxu1 }
 0x2f0   :  { %v824_v57 = vadd.f32 %v776_v2, %v2219_v35  ;;  %v826_v11 = vadd.f32 %v817_v46, %v2222_v36 }
 0x2f1   :  { %v778_v61 = vpop.f32.mrf.mxu0  ;;  %v819_v60 = vpop.f32.mrf.mxu1 }
 0x2f2   :  { %v1639_v52 = vmul.f32 -1.442695, %v824_v57  ;;  %v825_v3 = vadd.f32 %v778_v61, %v2224_v47  ;;  %v1641_v5 = vmul.f32 -1.442695, %v826_v11  ;;  %v827_v7 = vadd.f32 %v819_v60, %v2659_v16  ;;  %v2660_v60 = vld [vmem:[#allocation8_spill] sm:$0xff] }
 0x2f3   :  { %v780_v59 = vpop.f32.mrf.mxu0  ;;  %v821_v14 = vpop.f32.mrf.mxu1 }
 0x2f4   :  { %1798 = vpow2.f32 %v1639_v52  ;;  %v1640_v9 = vmul.f32 -1.442695, %v825_v3 }
 0x2f5   :  { %v781_v0 = vpop.f32.mrf.mxu0  ;;  %v822_v1 = vpop.f32.mrf.mxu1 }
 0x2f6   :  { %1800 = vpow2.f32 %v1640_v9  ;;  %v2661_v9 = vld [vmem:[#allocation10_spill] sm:$0xff] }
 0x2f7   :  { %1802 = vpow2.f32 %v1641_v5 }
 0x2f8   :  { %1804 = vtanh.f32 %v827_v7 }
 0x301   :  { %v1799_v58 = vpop.eup %1798 }
 0x302   :  { %v837_v62 = vadd.f32 1.0, %v1799_v58  ;;  %v2662_v58 = vld [vmem:[#allocation9_spill] sm:$0xff] }
 0x303   :  { %v1801_v35 = vpop.eup %1800 }
 0x304   :  { %1806 = vrcp.f32 %v837_v62  ;;  %v838_v63 = vadd.f32 1.0, %v1801_v35  ;;  %v1803_v47 = vpop.eup %1802 }
 0x305   :  { %v1805_v13 = vpop.eup %1804  ;;  %v839_v4 = vadd.f32 1.0, %v1803_v47 }
 0x306   :  { %1808 = vrcp.f32 %v838_v63 }
 0x307   :  { %1810 = vrcp.f32 %v839_v4 }
 0x311   :  { %v1807_v25 = vpop.eup %1806 }
 0x312   :  { %v848_v24 = vmul.f32 %v1807_v25, %v1805_v13 }
 0x313   :  { %v1809_v6 = vpop.eup %1808 }
 0x314   :  { %v847_v10 = vmul.f32 %v1809_v6, %v2327_v12  ;;  %v1811_v2 = vpop.eup %1810 }
 0x316   :  { %v2369_v36 = vadd.f32 %v848_v24, %v847_v10 }
 0x318   :  { %1812 = vtanh.f32 %v2369_v36 }
 0x325   :  { %v1813_v46 = vpop.eup %1812 }
 0x326   :  { %v851_v57 = vmul.f32 %v1813_v46, %v1811_v2 }
 0x328   :  { %v859_v61 = vpack.c.bf16 %v851_v57, %v851_v57 }
 0x32a   :  { %893 = vmatmul.mubr.bf16.vlgmr.msra.gmra.mxu0 %v859_v61  ;;  %934 = vmatmul.mubr.bf16.vlgmr.msra.gmra.mxu1 %v859_v61 }
 0x32b   :  { %979 = vmatpush1.bf16.msra.mxu0 %v2030_v18  ;;  %1020 = vmatpush1.bf16.msra.mxu1 %v2032_v19 }
 0x32c   :  { %980 = vmatprep.subr.bf16.mxu0 %v2036_v20  ;;  %1021 = vmatprep.subr.bf16.mxu1 %v2038_v21 }
 0x32d   :  { %1010 = vmatprep.mubr.bf16.mxu0 %v2658_v8  ;;  %1051 = vmatprep.mubr.bf16.mxu1 %v2658_v8 }
 0x32f   :  { %981 = vmatpush1.bf16.msra.mxu0 %v2040_v22  ;;  %1022 = vmatpush1.bf16.msra.mxu1 %v2044_v23 }
 0x330   :  { %982 = vmatprep.subr.bf16.mxu0 %v2056_v26  ;;  %1023 = vmatprep.subr.bf16.mxu1 %v2058_v27 }
 0x333   :  { %983 = vmatpush1.bf16.msra.mxu0 %v2064_v29  ;;  %1024 = vmatpush1.bf16.msra.mxu1 %v2066_v30 }
 0x334   :  { %984 = vmatprep.subr.bf16.mxu0 %v2070_v31  ;;  %1025 = vmatprep.subr.bf16.mxu1 %v2072_v32 }
 0x337   :  { %985 = vmatpush1.bf16.msra.mxu0 %v2074_v33  ;;  %1026 = vmatpush1.bf16.msra.mxu1 %v2076_v34 }
 0x338   :  { %986 = vmatprep.subr.bf16.mxu0 %v2088_v37  ;;  %1027 = vmatprep.subr.bf16.mxu1 %v2092_v38 }
 0x33b   :  { %987 = vmatpush1.bf16.msra.mxu0 %v2096_v40  ;;  %1028 = vmatpush1.bf16.msra.mxu1 %v2100_v41 }
 0x33c   :  { %988 = vmatprep.subr.bf16.mxu0 %v2104_v42  ;;  %1029 = vmatprep.subr.bf16.mxu1 %v2106_v43 }
 0x33f   :  { %989 = vmatpush1.bf16.msra.mxu0 %v2108_v44  ;;  %1030 = vmatpush1.bf16.msra.mxu1 %v2112_v45 }
 0x340   :  { %990 = vmatprep.subr.bf16.mxu0 %v2122_v48  ;;  %1031 = vmatprep.subr.bf16.mxu1 %v2126_v49 }
 0x343   :  { %991 = vmatpush1.bf16.msra.mxu0 %v2130_v50  ;;  %1032 = vmatpush1.bf16.msra.mxu1 %v2132_v51 }
 0x344   :  { %992 = vmatprep.subr.bf16.mxu0 %v2134_v53  ;;  %1033 = vmatprep.subr.bf16.mxu1 %v2136_v54 }
 0x347   :  { %993 = vmatpush1.bf16.msra.mxu0 %v2146_v55  ;;  %1034 = vmatpush1.bf16.msra.mxu1 %v2148_v56 }
 0x348   :  { %1096 = vmatprep.subr.bf16.mxu0 %v2026_v15  ;;  %1137 = vmatprep.subr.bf16.mxu1 %v2028_v17  ;;  %v2663_v17 = vld [vmem:[#allocation11_spill] sm:$0xff] }
 0x3ea   :  { %v894_v18 = vpop.f32.mrf.mxu0  ;;  %v935_v12 = vpop.f32.mrf.mxu1 }
 0x3eb   :  { %v942_v52 = vadd.f32 %v894_v18, %v2660_v60  ;;  %v944_v15 = vadd.f32 %v935_v12, %v2662_v58 }
 0x3ec   :  { %v896_v3 = vpop.f32.mrf.mxu0  ;;  %v937_v59 = vpop.f32.mrf.mxu1 }
 0x3ed   :  { %v1642_v14 = vmul.f32 -1.442695, %v942_v52  ;;  %v943_v0 = vadd.f32 %v896_v3, %v2661_v9  ;;  %v1644_v62 = vmul.f32 -1.442695, %v944_v15  ;;  %v945_v35 = vadd.f32 %v937_v59, %v2663_v17  ;;  %v2414_v3 = vld [vmem:[#allocation4 + $0xe0] ss:$16 sps:$4 sm:$0xff]  }
 0x3ee   :  { %v898_v1 = vpop.f32.mrf.mxu0  ;;  %v939_v11 = vpop.f32.mrf.mxu1  ;;  %v2466_v17 = vld [vmem:[#allocation4 + $0xc4] ss:$16 sps:$4 sm:$0xff]  }
 0x3ef   :  { %1814 = vpow2.f32 %v1642_v14  ;;  %v1643_v5 = vmul.f32 -1.442695, %v943_v0 }
 0x3f0   :  { %v899_v16 = vpop.f32.mrf.mxu0  ;;  %v940_v7 = vpop.f32.mrf.mxu1 }
 0x3f1   :  { %1816 = vpow2.f32 %v1643_v5 }
 0x3f2   :  { %1818 = vpow2.f32 %v1644_v62  ;;  %v2463_v62 = vld [vmem:[#allocation4 + $0xe8] ss:$16 sps:$4 sm:$0xff]  }
 0x3f3   :  { %1820 = vtanh.f32 %v945_v35  ;;  %v2469_v35 = vld [vmem:[#allocation4 + $0xcc] ss:$16 sps:$4 sm:$0xff]  }
 0x3fc   :  { %v1815_v63 = vpop.eup %1814 }
 0x3fd   :  { %v955_v47 = vadd.f32 1.0, %v1815_v63  ;;  %v2474_v63 = vld [vmem:[#allocation4 + $0xc0] ss:$16 sps:$4 sm:$0xff]  }
 0x3fe   :  { %v1817_v13 = vpop.eup %1816 }
 0x3ff   :  { %1822 = vrcp.f32 %v955_v47  ;;  %v956_v25 = vadd.f32 1.0, %v1817_v13  ;;  %v1819_v24 = vpop.eup %1818  ;;  %v2477_v47 = vld [vmem:[#allocation4 + $0xc8] ss:$16 sps:$4 sm:$0xff]   ;;  %v2480_v13 = vld [vmem:[#allocation4 + $0xa4] ss:$16 sps:$4 sm:$0xff]  }
 0x400   :  { %v1821_v6 = vpop.eup %1820  ;;  %v957_v46 = vadd.f32 1.0, %v1819_v24  ;;  %v2486_v24 = vld [vmem:[#allocation4 + $0xa0] ss:$16 sps:$4 sm:$0xff]  }
 0x401   :  { %1824 = vrcp.f32 %v956_v25  ;;  %v2483_v25 = vld [vmem:[#allocation4 + $0xac] ss:$16 sps:$4 sm:$0xff]  }
 0x402   :  { %1826 = vrcp.f32 %v957_v46  ;;  %v2501_v46 = vld [vmem:[#allocation4 + $0x88] ss:$16 sps:$4 sm:$0xff]  }
 0x40c   :  { %v1823_v4 = vpop.eup %1822 }
 0x40d   :  { %v966_v10 = vmul.f32 %v1823_v4, %v1821_v6  ;;  %v2489_v6 = vld [vmem:[#allocation4 + $0xa8] ss:$16 sps:$4 sm:$0xff]   ;;  %v2492_v4 = vld [vmem:[#allocation4 + $0x84] ss:$16 sps:$4 sm:$0xff]  }
 0x40e   :  { %v1825_v2 = vpop.eup %1824 }
 0x40f   :  { %v965_v57 = vmul.f32 %v1825_v2, %v2369_v36  ;;  %v1827_v18 = vpop.eup %1826  ;;  %v2498_v2 = vld [vmem:[#allocation4 + $0x80] ss:$16 sps:$4 sm:$0xff]  }
 0x411   :  { %v2411_v61 = vadd.f32 %v966_v10, %v965_v57  ;;  %v2495_v10 = vld [vmem:[#allocation4 + $0x8c] ss:$16 sps:$4 sm:$0xff]   ;;  %v2504_v57 = vld [vmem:[#allocation4 + $0x64] ss:$16 sps:$4 sm:$0xff]  }
 0x413   :  { %1828 = vtanh.f32 %v2411_v61 }
 0x420   :  { %v1829_v12 = vpop.eup %1828 }
 0x421   :  { %v969_v60 = vmul.f32 %v1829_v12, %v1827_v18  ;;  %v2510_v18 = vld [vmem:[#allocation4 + $0x60] ss:$16 sps:$4 sm:$0xff]   ;;  %v2513_v12 = vld [vmem:[#allocation4 + $0x68] ss:$16 sps:$4 sm:$0xff]  }
 0x423   :  { %v977_v52 = vpack.c.bf16 %v969_v60, %v969_v60  ;;  %v2516_v60 = vld [vmem:[#allocation4 + $0x44] ss:$16 sps:$4 sm:$0xff]  }
 0x425   :  { %1011 = vmatmul.mubr.bf16.vlgmr.msra.gmra.mxu0 %v977_v52  ;;  %1052 = vmatmul.mubr.bf16.vlgmr.msra.gmra.mxu1 %v977_v52  ;;  %v2519_v52 = vld [vmem:[#allocation4 + $0x4c] ss:$16 sps:$4 sm:$0xff]  }
 0x426   :  { %1097 = vmatpush1.bf16.msra.mxu0 %v2414_v3  ;;  %1138 = vmatpush1.bf16.msra.mxu1 %v2032_v19  ;;  %v2448_v19 = vld [vmem:[#allocation4 + $0xe4] ss:$16 sps:$4 sm:$0xff]  }
 0x427   :  { %1098 = vmatprep.subr.bf16.mxu0 %v2036_v20  ;;  %1139 = vmatprep.subr.bf16.mxu1 %v2038_v21  ;;  %v2451_v20 = vld [vmem:[#allocation4 + $0xec] ss:$16 sps:$4 sm:$0xff]  }
 0x428   :  { %1128 = vmatprep.mubr.bf16.mxu0 %v2658_v8  ;;  %1169 = vmatprep.mubr.bf16.mxu1 %v2658_v8 }
 0x42a   :  { %1099 = vmatpush1.bf16.msra.mxu0 %v2040_v22  ;;  %1140 = vmatpush1.bf16.msra.mxu1 %v2044_v23  ;;  %v2664_v23 = vld [vmem:[#allocation12_spill] sm:$0xff] }
 0x42b   :  { %1100 = vmatprep.subr.bf16.mxu0 %v2056_v26  ;;  %1141 = vmatprep.subr.bf16.mxu1 %v2058_v27 }
 0x42e   :  { %1101 = vmatpush1.bf16.msra.mxu0 %v2064_v29  ;;  %1142 = vmatpush1.bf16.msra.mxu1 %v2066_v30 }
 0x42f   :  { %1102 = vmatprep.subr.bf16.mxu0 %v2070_v31  ;;  %1143 = vmatprep.subr.bf16.mxu1 %v2072_v32  ;;  %v2665_v31 = vld [vmem:[#allocation14_spill] sm:$0xff] }
 0x432   :  { %1103 = vmatpush1.bf16.msra.mxu0 %v2074_v33  ;;  %1144 = vmatpush1.bf16.msra.mxu1 %v2076_v34 }
 0x433   :  { %1104 = vmatprep.subr.bf16.mxu0 %v2088_v37  ;;  %1145 = vmatprep.subr.bf16.mxu1 %v2092_v38 }
 0x436   :  { %1105 = vmatpush1.bf16.msra.mxu0 %v2096_v40  ;;  %1146 = vmatpush1.bf16.msra.mxu1 %v2100_v41  ;;  %v2666_v41 = vld [vmem:[#allocation13_spill] sm:$0xff] }
 0x437   :  { %1106 = vmatprep.subr.bf16.mxu0 %v2104_v42  ;;  %1147 = vmatprep.subr.bf16.mxu1 %v2106_v43 }
 0x43a   :  { %1107 = vmatpush1.bf16.msra.mxu0 %v2108_v44  ;;  %1148 = vmatpush1.bf16.msra.mxu1 %v2112_v45  ;;  %v2667_v44 = vld [vmem:[#allocation15_spill] sm:$0xff] }
 0x43b   :  { %1108 = vmatprep.subr.bf16.mxu0 %v2122_v48  ;;  %1149 = vmatprep.subr.bf16.mxu1 %v2126_v49 }
 0x43e   :  { %1109 = vmatpush1.bf16.msra.mxu0 %v2130_v50  ;;  %1150 = vmatpush1.bf16.msra.mxu1 %v2132_v51 }
 0x43f   :  { %1110 = vmatprep.subr.bf16.mxu0 %v2134_v53  ;;  %1151 = vmatprep.subr.bf16.mxu1 %v2136_v54 }
 0x442   :  { %1111 = vmatpush1.bf16.msra.mxu0 %v2146_v55  ;;  %1152 = vmatpush1.bf16.msra.mxu1 %v2148_v56 }
 0x443   :  { %1214 = vmatprep.subr.bf16.mxu0 %v2448_v19  ;;  %1255 = vmatprep.subr.bf16.mxu1 %v2451_v20 }
 0x4e5   :  { %v1012_v21 = vpop.f32.mrf.mxu0  ;;  %v1053_v22 = vpop.f32.mrf.mxu1 }
 0x4e6   :  { %v1060_v26 = vadd.f32 %v1012_v21, %v2664_v23  ;;  %v1062_v42 = vadd.f32 %v1053_v22, %v2666_v41  ;;  %v2522_v21 = vld [vmem:[#allocation4 + $0x40] ss:$16 sps:$4 sm:$0xff]   ;;  %v2525_v22 = vld [vmem:[#allocation4 + $0x48] ss:$16 sps:$4 sm:$0xff]   ;;  %v2528_v23 = vld [vmem:[#allocation4 + $0x24] ss:$16 sps:$4 sm:$0xff]  }
 0x4e7   :  { %v1014_v27 = vpop.f32.mrf.mxu0  ;;  %v1055_v29 = vpop.f32.mrf.mxu1 }
 0x4e8   :  { %v1645_v30 = vmul.f32 -1.442695, %v1060_v26  ;;  %v1061_v32 = vadd.f32 %v1014_v27, %v2665_v31  ;;  %v1647_v43 = vmul.f32 -1.442695, %v1062_v42  ;;  %v1063_v45 = vadd.f32 %v1055_v29, %v2667_v44  ;;  %v2531_v26 = vld [vmem:[#allocation4 + $0x2c] ss:$16 sps:$4 sm:$0xff]  }
 0x4e9   :  { %v1016_v33 = vpop.f32.mrf.mxu0  ;;  %v1057_v34 = vpop.f32.mrf.mxu1  ;;  %v2534_v27 = vld [vmem:[#allocation4 + $0x20] ss:$16 sps:$4 sm:$0xff]   ;;  %v2537_v29 = vld [vmem:[#allocation4 + $0x28] ss:$16 sps:$4 sm:$0xff]  }
 0x4ea   :  { %1830 = vpow2.f32 %v1645_v30  ;;  %v1646_v37 = vmul.f32 -1.442695, %v1061_v32  ;;  %v2668_v32 = vld [vmem:[#allocation16_spill] sm:$0xff] }
 0x4eb   :  { %v1017_v38 = vpop.f32.mrf.mxu0  ;;  %v1058_v40 = vpop.f32.mrf.mxu1 }
 0x4ec   :  { %1832 = vpow2.f32 %v1646_v37  ;;  %v2669_v40 = vld [vmem:[#allocation18_spill] sm:$0xff] }
 0x4ed   :  { %1834 = vpow2.f32 %v1647_v43 }
 0x4ee   :  { %1836 = vtanh.f32 %v1063_v45 }
 0x4f7   :  { %v1831_v48 = vpop.eup %1830 }
 0x4f8   :  { %v1073_v49 = vadd.f32 1.0, %v1831_v48 }
 0x4f9   :  { %v1833_v50 = vpop.eup %1832 }
 0x4fa   :  { %1838 = vrcp.f32 %v1073_v49  ;;  %v1074_v51 = vadd.f32 1.0, %v1833_v50  ;;  %v1835_v36 = vpop.eup %1834 }
 0x4fb   :  { %v1837_v59 = vpop.eup %1836  ;;  %v1075_v1 = vadd.f32 1.0, %v1835_v36 }
 0x4fc   :  { %1840 = vrcp.f32 %v1074_v51 }
 0x4fd   :  { %1842 = vrcp.f32 %v1075_v1 }
 0x507   :  { %v1839_v14 = vpop.eup %1838 }
 0x508   :  { %v1084_v9 = vmul.f32 %v1839_v14, %v1837_v59 }
 0x509   :  { %v1841_v0 = vpop.eup %1840 }
 0x50a   :  { %v1083_v11 = vmul.f32 %v1841_v0, %v2411_v61  ;;  %v1843_v16 = vpop.eup %1842  ;;  %v2507_v61 = vld [vmem:[#allocation4 + $0x6c] ss:$16 sps:$4 sm:$0xff]  }
 0x50c   :  { %v2459_v5 = vadd.f32 %v1084_v9, %v1083_v11 }
 0x50e   :  { %1844 = vtanh.f32 %v2459_v5 }
 0x51b   :  { %v1845_v7 = vpop.eup %1844 }
 0x51c   :  { %v1087_v58 = vmul.f32 %v1845_v7, %v1843_v16 }
 0x51e   :  { %v1095_v15 = vpack.c.bf16 %v1087_v58, %v1087_v58 }
 0x520   :  { %1129 = vmatmul.mubr.bf16.vlgmr.msra.gmra.mxu0 %v1095_v15  ;;  %1170 = vmatmul.mubr.bf16.vlgmr.msra.gmra.mxu1 %v1095_v15 }
 0x521   :  { %1215 = vmatpush1.bf16.msra.mxu0 %v2414_v3  ;;  %1256 = vmatpush1.bf16.msra.mxu1 %v2463_v62 }
 0x522   :  { %1216 = vmatprep.subr.bf16.mxu0 %v2466_v17  ;;  %1257 = vmatprep.subr.bf16.mxu1 %v2469_v35 }
 0x523   :  { %1246 = vmatprep.mubr.bf16.mxu0 %v2658_v8  ;;  %1287 = vmatprep.mubr.bf16.mxu1 %v2658_v8 }
 0x525   :  { %1217 = vmatpush1.bf16.msra.mxu0 %v2474_v63  ;;  %1258 = vmatpush1.bf16.msra.mxu1 %v2477_v47 }
 0x526   :  { %1218 = vmatprep.subr.bf16.mxu0 %v2480_v13  ;;  %1259 = vmatprep.subr.bf16.mxu1 %v2483_v25 }
 0x529   :  { %1219 = vmatpush1.bf16.msra.mxu0 %v2486_v24  ;;  %1260 = vmatpush1.bf16.msra.mxu1 %v2489_v6 }
 0x52a   :  { %1220 = vmatprep.subr.bf16.mxu0 %v2492_v4  ;;  %1261 = vmatprep.subr.bf16.mxu1 %v2495_v10 }
 0x52d   :  { %1221 = vmatpush1.bf16.msra.mxu0 %v2498_v2  ;;  %1262 = vmatpush1.bf16.msra.mxu1 %v2501_v46 }
 0x52e   :  { %1222 = vmatprep.subr.bf16.mxu0 %v2504_v57  ;;  %1263 = vmatprep.subr.bf16.mxu1 %v2507_v61 }
 0x531   :  { %1223 = vmatpush1.bf16.msra.mxu0 %v2510_v18  ;;  %1264 = vmatpush1.bf16.msra.mxu1 %v2513_v12 }
 0x532   :  { %1224 = vmatprep.subr.bf16.mxu0 %v2516_v60  ;;  %1265 = vmatprep.subr.bf16.mxu1 %v2519_v52 }
 0x535   :  { %1225 = vmatpush1.bf16.msra.mxu0 %v2522_v21  ;;  %1266 = vmatpush1.bf16.msra.mxu1 %v2525_v22 }
 0x536   :  { %1226 = vmatprep.subr.bf16.mxu0 %v2528_v23  ;;  %1267 = vmatprep.subr.bf16.mxu1 %v2531_v26 }
 0x539   :  { %1227 = vmatpush1.bf16.msra.mxu0 %v2534_v27  ;;  %1268 = vmatpush1.bf16.msra.mxu1 %v2537_v29 }
 0x53a   :  { %1228 = vmatprep.subr.bf16.mxu0 %v2134_v53  ;;  %1269 = vmatprep.subr.bf16.mxu1 %v2136_v54 }
 0x53d   :  { %1229 = vmatpush1.bf16.msra.mxu0 %v2146_v55  ;;  %1270 = vmatpush1.bf16.msra.mxu1 %v2148_v56  ;;  %v2670_v56 = vld [vmem:[#allocation17_spill] sm:$0xff] }
 0x53e   :  { %1332 = vmatprep.subr.bf16.mxu0 %v2448_v19  ;;  %1373 = vmatprep.subr.bf16.mxu1 %v2451_v20  ;;  %v2671_v20 = vld [vmem:[#allocation19_spill] sm:$0xff] }
 0x5e0   :  { %v1130_v30 = vpop.f32.mrf.mxu0  ;;  %v1171_v31 = vpop.f32.mrf.mxu1 }
 0x5e1   :  { %v1178_v33 = vadd.f32 %v1130_v30, %v2668_v32  ;;  %v1180_v19 = vadd.f32 %v1171_v31, %v2670_v56  ;;  %v1759_v56 = vld [vmem:[%s2632_s4 + $0x30] sm:$0xff]  }
 0x5e2   :  { %v1132_v34 = vpop.f32.mrf.mxu0  ;;  %v1173_v37 = vpop.f32.mrf.mxu1 }
 0x5e3   :  { %v1648_v38 = vmul.f32 -1.442695, %v1178_v33  ;;  %v1179_v41 = vadd.f32 %v1132_v34, %v2669_v40  ;;  %v1650_v44 = vmul.f32 -1.442695, %v1180_v19  ;;  %v1181_v45 = vadd.f32 %v1173_v37, %v2671_v20  ;;  %v1760_v19 = vld [vmem:[%s2632_s4 + $0x28] sm:$0xff]   ;;  %v1762_v20 = vld [vmem:[%s2632_s4 + $0x18] sm:$0xff]  }
 0x5e4   :  { %v1134_v53 = vpop.f32.mrf.mxu0  ;;  %v1175_v42 = vpop.f32.mrf.mxu1 }
 0x5e5   :  { %1846 = vpow2.f32 %v1648_v38  ;;  %v1649_v54 = vmul.f32 -1.442695, %v1179_v41 }
 0x5e6   :  { %v1135_v55 = vpop.f32.mrf.mxu0  ;;  %v1176_v43 = vpop.f32.mrf.mxu1 }
 0x5e7   :  { %1848 = vpow2.f32 %v1649_v54  ;;  %v1758_v55 = vld [vmem:[%s2632_s4 + $0x38] sm:$0xff]   ;;  %v1953_v43 = vmov 0.0  }
 0x5e8   :  { %1850 = vpow2.f32 %v1650_v44  ;;  %v1761_v44 = vld [vmem:[%s2632_s4 + $0x20] sm:$0xff]  }
 0x5e9   :  { %1852 = vtanh.f32 %v1181_v45  ;;  %v1763_v45 = vld [vmem:[%s2632_s4 + $0x10] sm:$0xff]  }
 0x5f2   :  { %v1847_v48 = vpop.eup %1846 }
 0x5f3   :  { %v1191_v49 = vadd.f32 1.0, %v1847_v48  ;;  %v1764_v48 = vld [vmem:[%s2632_s4 + $0x8] sm:$0xff]  }
 0x5f4   :  { %v1849_v50 = vpop.eup %1848 }
 0x5f5   :  { %1854 = vrcp.f32 %v1191_v49  ;;  %v1192_v51 = vadd.f32 1.0, %v1849_v50  ;;  %v1851_v36 = vpop.eup %1850  ;;  %v1765_v49 = vld [vmem:[%s2632_s4] sm:$0xff]  }
 0x5f6   :  { %v1853_v59 = vpop.eup %1852  ;;  %v1193_v1 = vadd.f32 1.0, %v1851_v36  ;;  %v2676_v36 = vld [vmem:[#allocation24_spill] sm:$0xff] }
 0x5f7   :  { %1856 = vrcp.f32 %v1192_v51 }
 0x5f8   :  { %1858 = vrcp.f32 %v1193_v1 }
 0x602   :  { %v1855_v14 = vpop.eup %1854 }
 0x603   :  { %v1202_v9 = vmul.f32 %v1855_v14, %v1853_v59 }
 0x604   :  { %v1857_v0 = vpop.eup %1856 }
 0x605   :  { %v1201_v11 = vmul.f32 %v1857_v0, %v2459_v5  ;;  %v1859_v7 = vpop.eup %1858  ;;  %v1924_v5 = vld [vmem:[#allocation4] ss:$16 sps:$4 sm:$0xff]  }
 0x607   :  { %v2551_v16 = vadd.f32 %v1202_v9, %v1201_v11 }
 0x609   :  { %1860 = vtanh.f32 %v2551_v16 }
 0x616   :  { %v1861_v58 = vpop.eup %1860 }
 0x617   :  { %v1205_v15 = vmul.f32 %v1861_v58, %v1859_v7 }
 0x619   :  { %v1213_v30 = vpack.c.bf16 %v1205_v15, %v1205_v15 }
 0x61b   :  { %1247 = vmatmul.mubr.bf16.vlgmr.msra.gmra.mxu0 %v1213_v30  ;;  %1288 = vmatmul.mubr.bf16.vlgmr.msra.gmra.mxu1 %v1213_v30  ;;  %v2677_v30 = vld [vmem:[#allocation25_spill] sm:$0xff] }
 0x61c   :  { %1333 = vmatpush1.bf16.msra.mxu0 %v2414_v3  ;;  %1374 = vmatpush1.bf16.msra.mxu1 %v2463_v62  ;;  %v1923_v3 = vld [vmem:[#allocation4 + $0xc] ss:$16 sps:$4 sm:$0xff]   ;;  %v1925_v62 = vld [vmem:[#allocation4 + $0x8] ss:$16 sps:$4 sm:$0xff]  }
 0x61d   :  { %1334 = vmatprep.subr.bf16.mxu0 %v2466_v17  ;;  %1375 = vmatprep.subr.bf16.mxu1 %v2469_v35 }
 0x61e   :  { %1364 = vmatprep.mubr.bf16.mxu0 %v2658_v8  ;;  %1405 = vmatprep.mubr.bf16.mxu1 %v2658_v8  ;;  %v1922_v8 = vld [vmem:[#allocation4 + $0x4] ss:$16 sps:$4 sm:$0xff]  }
 0x620   :  { %1335 = vmatpush1.bf16.msra.mxu0 %v2474_v63  ;;  %1376 = vmatpush1.bf16.msra.mxu1 %v2477_v47  ;;  %v2672_v63 = vld [vmem:[#allocation20_spill] sm:$0xff] }
 0x621   :  { %1336 = vmatprep.subr.bf16.mxu0 %v2480_v13  ;;  %1377 = vmatprep.subr.bf16.mxu1 %v2483_v25 }
 0x624   :  { %1337 = vmatpush1.bf16.msra.mxu0 %v2486_v24  ;;  %1378 = vmatpush1.bf16.msra.mxu1 %v2489_v6  ;;  %v2673_v6 = vld [vmem:[#allocation22_spill] sm:$0xff] }
 0x625   :  { %1338 = vmatprep.subr.bf16.mxu0 %v2492_v4  ;;  %1379 = vmatprep.subr.bf16.mxu1 %v2495_v10 }
 0x628   :  { %1339 = vmatpush1.bf16.msra.mxu0 %v2498_v2  ;;  %1380 = vmatpush1.bf16.msra.mxu1 %v2501_v46 }
 0x629   :  { %1340 = vmatprep.subr.bf16.mxu0 %v2504_v57  ;;  %1381 = vmatprep.subr.bf16.mxu1 %v2507_v61 }
 0x62c   :  { %1341 = vmatpush1.bf16.msra.mxu0 %v2510_v18  ;;  %1382 = vmatpush1.bf16.msra.mxu1 %v2513_v12  ;;  %v2674_v18 = vld [vmem:[#allocation21_spill] sm:$0xff] }
 0x62d   :  { %1342 = vmatprep.subr.bf16.mxu0 %v2516_v60  ;;  %1383 = vmatprep.subr.bf16.mxu1 %v2519_v52  ;;  %v2675_v52 = vld [vmem:[#allocation23_spill] sm:$0xff] }
 0x630   :  { %1343 = vmatpush1.bf16.msra.mxu0 %v2522_v21  ;;  %1384 = vmatpush1.bf16.msra.mxu1 %v2525_v22 }
 0x631   :  { %1344 = vmatprep.subr.bf16.mxu0 %v2528_v23  ;;  %1385 = vmatprep.subr.bf16.mxu1 %v2531_v26 }
 0x634   :  { %1345 = vmatpush1.bf16.msra.mxu0 %v2534_v27  ;;  %1386 = vmatpush1.bf16.msra.mxu1 %v2537_v29 }
 0x635   :  { %1346 = vmatprep.subr.bf16.mxu0 %v1922_v8  ;;  %1387 = vmatprep.subr.bf16.mxu1 %v1923_v3 }
 0x638   :  { %1347 = vmatpush1.bf16.msra.mxu0 %v1924_v5  ;;  %1388 = vmatpush1.bf16.msra.mxu1 %v1925_v62 }
 0x639   :  { %1677 = vmatprep.subr.bf16.mxu0 %v1953_v43 }
 0x6db   :  { %v1248_v17 = vpop.f32.mrf.mxu0  ;;  %v1289_v35 = vpop.f32.mrf.mxu1 }
 0x6dc   :  { %v1296_v47 = vadd.f32 %v1248_v17, %v2672_v63  ;;  %v1298_v12 = vadd.f32 %v1289_v35, %v2674_v18 }
 0x6dd   :  { %v1250_v13 = vpop.f32.mrf.mxu0  ;;  %v1291_v25 = vpop.f32.mrf.mxu1 }
 0x6de   :  { %v1651_v24 = vmul.f32 -1.442695, %v1296_v47  ;;  %v1297_v4 = vadd.f32 %v1250_v13, %v2673_v6  ;;  %v1653_v60 = vmul.f32 -1.442695, %v1298_v12  ;;  %v1299_v21 = vadd.f32 %v1291_v25, %v2675_v52 }
 0x6df   :  { %v1252_v10 = vpop.f32.mrf.mxu0  ;;  %v1293_v2 = vpop.f32.mrf.mxu1 }
 0x6e0   :  { %1862 = vpow2.f32 %v1651_v24  ;;  %v1652_v46 = vmul.f32 -1.442695, %v1297_v4 }
 0x6e1   :  { %v1253_v57 = vpop.f32.mrf.mxu0  ;;  %v1294_v61 = vpop.f32.mrf.mxu1 }
 0x6e2   :  { %1864 = vpow2.f32 %v1652_v46  ;;  %v1657_v61 = vld [vmem:[%s2633_s5] ss:$0 sm:$0xff] }
 0x6e3   :  { %1866 = vpow2.f32 %v1653_v60 }
 0x6e4   :  { %1868 = vtanh.f32 %v1299_v21  ;;  %v1666_v21 = vld [vmem:[%s2634_s6] ss:$0 sm:$0xff] }
 0x6ed   :  { %v1863_v22 = vpop.eup %1862 }
 0x6ee   :  { %v1309_v23 = vadd.f32 1.0, %v1863_v22 }
 0x6ef   :  { %v1865_v26 = vpop.eup %1864 }
 0x6f0   :  { %1870 = vrcp.f32 %v1309_v23  ;;  %v1310_v27 = vadd.f32 1.0, %v1865_v26  ;;  %v1867_v29 = vpop.eup %1866 }
 0x6f1   :  { %v1869_v31 = vpop.eup %1868  ;;  %v1311_v37 = vadd.f32 1.0, %v1867_v29  ;;  %v1667_v29 = vld [vmem:[#allocation3] ss:$0 sm:$0xff] }
 0x6f2   :  { %1872 = vrcp.f32 %v1310_v27 }
 0x6f3   :  { %1874 = vrcp.f32 %v1311_v37 }
 0x6fd   :  { %v1871_v32 = vpop.eup %1870 }
 0x6fe   :  { %v1320_v33 = vmul.f32 %v1871_v32, %v1869_v31 }
 0x6ff   :  { %v1873_v34 = vpop.eup %1872 }
 0x700   :  { %v1319_v38 = vmul.f32 %v1873_v34, %v2551_v16  ;;  %v1875_v41 = vpop.eup %1874 }
 0x702   :  { %v2587_v40 = vadd.f32 %v1320_v33, %v1319_v38 }
 0x704   :  { %1876 = vtanh.f32 %v2587_v40 }
 0x711   :  { %v1877_v53 = vpop.eup %1876 }
 0x712   :  { %v1323_v42 = vmul.f32 %v1877_v53, %v1875_v41 }
 0x714   :  { %v1331_v54 = vpack.c.bf16 %v1323_v42, %v1323_v42 }
 0x716   :  { %1365 = vmatmul.mubr.bf16.vlgmr.msra.gmra.mxu0 %v1331_v54  ;;  %1406 = vmatmul.mubr.bf16.vlgmr.msra.gmra.mxu1 %v1331_v54 }
 0x717   :  { %1678 = vmatpush3.bf16.msra.mxu0 %v1758_v55  ;;  %1693 = vmatprep.mubr.msk.bf16.mxu0 %vm1954_vm3, %v1953_v43 }
 0x718   :  { %1679 = vmatprep.subr.bf16.mxu0 %v1953_v43 }
 0x71b   :  { %1680 = vmatpush3.bf16.msra.mxu0 %v1759_v56 }
 0x71c   :  { %1681 = vmatprep.subr.bf16.mxu0 %v1953_v43 }
 0x71f   :  { %1682 = vmatpush3.bf16.msra.mxu0 %v1760_v19 }
 0x720   :  { %1683 = vmatprep.subr.bf16.mxu0 %v1953_v43 }
 0x723   :  { %1684 = vmatpush3.bf16.msra.mxu0 %v1761_v44 }
 0x724   :  { %1685 = vmatprep.subr.bf16.mxu0 %v1953_v43 }
 0x727   :  { %1686 = vmatpush3.bf16.msra.mxu0 %v1762_v20 }
 0x728   :  { %1687 = vmatprep.subr.bf16.mxu0 %v1953_v43 }
 0x72b   :  { %1688 = vmatpush3.bf16.msra.mxu0 %v1763_v45 }
 0x72c   :  { %1689 = vmatprep.subr.bf16.mxu0 %v1953_v43 }
 0x72f   :  { %1690 = vmatpush3.bf16.msra.mxu0 %v1764_v48 }
 0x730   :  { %1691 = vmatprep.subr.bf16.mxu0 %v1953_v43 }
 0x733   :  { %1692 = vmatpush3.bf16.msra.mxu0 %v1765_v49 }
 0x7d6   :  { %v1366_v50 = vpop.f32.mrf.mxu0  ;;  %v1407_v51 = vpop.f32.mrf.mxu1 }
 0x7d7   :  { %v1414_v59 = vadd.f32 %v1366_v50, %v2676_v36  ;;  %v1416_v8 = vadd.f32 %v1407_v51, %v2677_v30 }
 0x7d8   :  { %v1368_v14 = vpop.f32.mrf.mxu0  ;;  %v1409_v9 = vpop.f32.mrf.mxu1 }
 0x7d9   :  { %v1654_v0 = vmul.f32 -1.442695, %v1414_v59  ;;  %v1415_v1 = vadd.f32 %v1368_v14, %v2275_v28  ;;  %v1656_v3 = vmul.f32 -1.442695, %v1416_v8  ;;  %v1417_v5 = vadd.f32 %v1409_v9, %v2278_v39 }
 0x7da   :  { %v1370_v11 = vpop.f32.mrf.mxu0  ;;  %v1411_v16 = vpop.f32.mrf.mxu1 }
 0x7db   :  { %1878 = vpow2.f32 %v1654_v0  ;;  %v1655_v7 = vmul.f32 -1.442695, %v1415_v1 }
 0x7dc   :  { %v1371_v58 = vpop.f32.mrf.mxu0  ;;  %v1412_v15 = vpop.f32.mrf.mxu1 }
 0x7dd   :  { %1880 = vpow2.f32 %v1655_v7 }
 0x7de   :  { %1882 = vpow2.f32 %v1656_v3 }
 0x7df   :  { %1884 = vtanh.f32 %v1417_v5 }
 0x7e8   :  { %v1879_v62 = vpop.eup %1878 }
 0x7e9   :  { %v1427_v17 = vadd.f32 1.0, %v1879_v62 }
 0x7ea   :  { %v1881_v35 = vpop.eup %1880 }
 0x7eb   :  { %1886 = vrcp.f32 %v1427_v17  ;;  %v1428_v63 = vadd.f32 1.0, %v1881_v35  ;;  %v1883_v28 = vpop.eup %1882 }
 0x7ec   :  { %v1885_v47 = vpop.eup %1884  ;;  %v1429_v6 = vadd.f32 1.0, %v1883_v28 }
 0x7ed   :  { %1888 = vrcp.f32 %v1428_v63 }
 0x7ee   :  { %1890 = vrcp.f32 %v1429_v6 }
 0x7f8   :  { %v1887_v13 = vpop.eup %1886 }
 0x7f9   :  { %v1438_v25 = vmul.f32 %v1887_v13, %v1885_v47 }
 0x7fa   :  { %v1889_v24 = vpop.eup %1888 }
 0x7fb   :  { %v1437_v4 = vmul.f32 %v1889_v24, %v2587_v40  ;;  %v1891_v39 = vpop.eup %1890 }
 0x7fd   :  { %v1439_v10 = vadd.f32 %v1438_v25, %v1437_v4 }
 0x7ff   :  { %1892 = vtanh.f32 %v1439_v10 }
 0x80c   :  { %v1893_v2 = vpop.eup %1892 }
 0x80d   :  { %v1441_v46 = vmul.f32 %v1893_v2, %v1891_v39 }
 0x80f   :  { %v1442_v57 = vpack.c.bf16 %v1441_v46, %v1441_v46 }
 0x811   :  { %1694 = vmatmul.mubr.bf16.vlgmr.msra.gmra.mxu0 %v1442_v57 }
 0x8d1   :  { %v1548_v18 = vpop.f32.mrf.mxu0 }
 0x8d2   :  { %v1549_v12 = vadd.f32 %v1657_v61, %v1548_v18 }
 0x8d3   :  { %v1695_v60 = vpop.f32.mrf.mxu0 }
 0x8d4   :  { %v1555_v52 = vmul.f32 0.2, %v1549_v12  ;;  %vm1554_vm4 = vcmp.gt.f32.partialorder %v1549_v12, 0.0 }
 0x8d5   :  { %v1551_v22 = vpop.f32.mrf.mxu0 }
 0x8d6   :  { %v1556_v23 = vsel %vm1554_vm4, %v1549_v12, %v1555_v52 }
 0x8d7   :  { %v1696_v26 = vpop.f32.mrf.mxu0  ;;  %v1564_v27 = vmul.f32 %v1666_v21, %v1556_v23 }
 0x8d9   :  { %1565 = vadd.xlane.f32.xlu0 %v1564_v27 }
 0x962   :  { %v1566_v31 = vpop.xlane.xlu0 %1565 }
 0x963   :  { %v1574_v32 = vadd.f32 %v1667_v29, %v1566_v31 }
 0x965   :  { %1576 = vst.msk [vmem:[%s2636_s8] sm:$0xff] %vm1575_vm5, %v1574_v32 }
 0x966   :  { %1581 = vsyncpa [#allocation5], 1 }

</bundles_post_ra>
